<compile_context>
chip_gen: v5e
topology: v5e:2x2
jax: 0.10.0
libtpu: 0.0.40
codegen_flags: <defaults>
</compile_context>

<pallas_src>
import math

import jax
import jax.numpy as jnp
import numpy as np
from jax import lax
from jax.experimental import pallas as pl
from jax.experimental.pallas import tpu as pltpu


def lstm_runoff_kernel(x_ref, wih1_ref, whh1_ref, b1_ref,
                       wih2_ref, whh2_ref, b2_ref, wfc_ref, bfc_ref,
                       out_ref, xp1_ref, h2s_ref):
    # x_ref:   (T*Bp, I)   time-major flattened input (row = t*Bp + b), Bp % 8 == 0
    # wih1:    (I, 4*H1)   whh1: (H1, 4*H1)   b1: (1, 4*H1)
    # wih2:    (H1, 4*H2)  whh2: (H2, 4*H2)   b2: (1, 4*H2)
    # wfc:     (1, 1, H2)  bfc: (1, 1)
    # out:     (Bp, T)
    # scratch: xp1 (T*Bp, 4*H1), h2s (T, Bp, H2)
    Bp, T = out_ref.shape
    H1 = whh1_ref.shape[0]
    H2 = whh2_ref.shape[0]

    whh1 = whh1_ref[...]
    wih2 = wih2_ref[...]
    whh2 = whh2_ref[...]
    b2 = b2_ref[...]

    # Hoisted layer-1 input projection: one M=T*Bp matmul, off the serial
    # recurrence path.
    xp1_ref[...] = (
        jnp.dot(x_ref[...], wih1_ref[...], preferred_element_type=jnp.float32)
        + b1_ref[...])

    def gates_to_hc(gates, c, H):
        # PyTorch gate order [i, f, g, o].
        i = jax.nn.sigmoid(gates[:, 0 * H:1 * H])
        f = jax.nn.sigmoid(gates[:, 1 * H:2 * H])
        g = jnp.tanh(gates[:, 2 * H:3 * H])
        o = jax.nn.sigmoid(gates[:, 3 * H:4 * H])
        c_new = f * c + i * g
        h_new = o * jnp.tanh(c_new)
        return h_new, c_new

    # All recurrent state lives in vregs — no VMEM round-trips inside the loop.
    h1 = jnp.zeros((Bp, H1), jnp.float32)
    c1 = jnp.zeros((Bp, H1), jnp.float32)
    h2 = jnp.zeros((Bp, H2), jnp.float32)
    c2 = jnp.zeros((Bp, H2), jnp.float32)

    # Fully unrolled time loop: T is small and static, so every slice below is
    # static and 8-row aligned, and independent steps can be overlapped by the
    # scheduler.  For long sequences use lax.fori_loop(..., unroll=4..8).
    for t in range(T):
        # ---- layer 1: only the recurrent matmul is on the serial chain ----
        g1 = (xp1_ref[pl.ds(t * Bp, Bp), :]
              + jnp.dot(h1, whh1, preferred_element_type=jnp.float32))
        h1, c1 = gates_to_hc(g1, c1, H1)
        # TODO(synk): nn.Dropout(p=0.1) is identity at inference; training-mode
        # stochastic masking is not reproduced here.

        # ---- layer 2: two vreg-resident matmuls, no VMEM staging ----
        g2 = (jnp.dot(h1, wih2, preferred_element_type=jnp.float32)
              + jnp.dot(h2, whh2, preferred_element_type=jnp.float32)
              + b2)
        h2, c2 = gates_to_hc(g2, c2, H2)
        h2s_ref[t] = h2              # leading-index, unmasked contiguous store

    # Final FC once, off the recurrence: VPU multiply + lane-reduce, one tiny
    # (T,Bp)->(Bp,T) XLU transpose in the epilogue, single dense store.
    y_tb = jnp.sum(h2s_ref[...] * wfc_ref[...], axis=-1)        # (T, Bp)
    out_ref[...] = jnp.transpose(y_tb, (1, 0)) + bfc_ref[...]


def _lstm_runoff_forward_impl(x, params):
    """x: (B, T, I) batch-first, like the PyTorch module. Returns (B, T)."""
    B, T, I = x.shape
    wih1, whh1, b1, wih2, whh2, b2, wfc, bfc = params
    H1 = whh1.shape[0]
    H2 = whh2.shape[0]

    # Pad batch to a sublane multiple (8): per-step tiles are aligned and the
    # padded rows are independent sequences that get sliced off at the end.
    Bp = max(8, ((B + 7) // 8) * 8)
    x_pad = jnp.pad(x.astype(jnp.float32), ((0, Bp - B), (0, 0), (0, 0)))
    # Time-major flatten so step t reads a contiguous, 8-row-aligned slab of
    # the precomputed layer-1 projection.
    x_flat = jnp.transpose(x_pad, (1, 0, 2)).reshape(T * Bp, I)
    wfc3 = wfc.reshape(1, 1, H2)                         # for bcast-mul + reduce

    out = pl.pallas_call(
        lstm_runoff_kernel,
        out_shape=jax.ShapeDtypeStruct((Bp, T), jnp.float32),
        in_specs=[pl.BlockSpec(memory_space=pltpu.MemorySpace.VMEM)] * 9,
        out_specs=pl.BlockSpec(memory_space=pltpu.MemorySpace.VMEM),
        scratch_shapes=[
            pltpu.VMEM((T * Bp, 4 * H1), jnp.float32),   # hoisted input proj
            pltpu.VMEM((T, Bp, H2), jnp.float32),        # per-step h2 for FC
        ],
        compiler_params=pltpu.CompilerParams(
            vmem_limit_bytes=32 * 1024 * 1024),
    )(x_flat, wih1, whh1, b1, wih2, whh2, b2, wfc3, bfc)

    return out[:B]                                       # (B, T)


# Jit the wrapper so pad/transpose/reshape fuse with the pallas_call.
lstm_runoff_forward = jax.jit(_lstm_runoff_forward_impl)


def ref_forward(x, params):
    """Pure-JAX reference of the PyTorch forward (eval mode)."""
    wih1, whh1, b1, wih2, whh2, b2, wfc, bfc = params
    B, _, _ = x.shape
    H1 = whh1.shape[0]
    H2 = whh2.shape[0]

    def cell(xt, h, c, wih, whh, b, H):
        g = xt @ wih + h @ whh + b
        i = jax.nn.sigmoid(g[:, :H])
        f = jax.nn.sigmoid(g[:, H:2 * H])
        gg = jnp.tanh(g[:, 2 * H:3 * H])
        o = jax.nn.sigmoid(g[:, 3 * H:])
        c = f * c + i * gg
        h = o * jnp.tanh(c)
        return h, c

    def step(carry, xt):
        h1, c1, h2, c2 = carry
        h1, c1 = cell(xt, h1, c1, wih1, whh1, b1, H1)
        h2, c2 = cell(h1, h2, c2, wih2, whh2, b2, H2)
        y = h2 @ wfc + bfc
        return (h1, c1, h2, c2), y[:, 0]

    init = (jnp.zeros((B, H1), jnp.float32), jnp.zeros((B, H1), jnp.float32),
            jnp.zeros((B, H2), jnp.float32), jnp.zeros((B, H2), jnp.float32))
    _, ys = lax.scan(step, init, jnp.transpose(x, (1, 0, 2)))
    return jnp.transpose(ys, (1, 0))


if __name__ == "__main__":
    B, T, I, H1, H2 = 2, 8, 4, 32, 32

    key = jax.random.PRNGKey(0)
    keys = jax.random.split(key, 9)
    k1 = 1.0 / math.sqrt(H1)
    k2 = 1.0 / math.sqrt(H2)

    def u(k, shape, scale):
        return jax.random.uniform(k, shape, jnp.float32, -scale, scale)

    # Parameters (deterministic, PyTorch-style U(-1/sqrt(H), 1/sqrt(H)) init).
    # Biases already fold b_ih + b_hh into one vector; weights pre-transposed.
    params = (
        u(keys[0], (I, 4 * H1), k1),    # lstm1 W_ih^T
        u(keys[1], (H1, 4 * H1), k1),   # lstm1 W_hh^T
        u(keys[2], (1, 4 * H1), k1),    # lstm1 bias (b_ih + b_hh folded)
        u(keys[3], (H1, 4 * H2), k2),   # lstm2 W_ih^T
        u(keys[4], (H2, 4 * H2), k2),   # lstm2 W_hh^T
        u(keys[5], (1, 4 * H2), k2),    # lstm2 bias (b_ih + b_hh folded)
        u(keys[6], (H2, 1), k2),        # fc weight^T
        u(keys[7], (1, 1), k2),         # fc bias
    )

    x = jax.random.normal(keys[8], (B, T, I), jnp.float32)

    out = jax.block_until_ready(lstm_runoff_forward(x, params))
    ref = ref_forward(x, params)

    assert out.shape == (B, T)
    np.testing.assert_allclose(np.asarray(out), np.asarray(ref),
                               rtol=1e-5, atol=1e-5)
    print("KERNEL_OK")
</pallas_src>

<mosaic_0001>
module attributes {stable_mosaic.version = 11 : i64} {
  func.func @lstm_runoff_kernel(%arg0: memref<64x4xf32, #tpu.memory_space<vmem>>, %arg1: memref<4x128xf32, #tpu.memory_space<vmem>>, %arg2: memref<32x128xf32, #tpu.memory_space<vmem>>, %arg3: memref<1x128xf32, #tpu.memory_space<vmem>>, %arg4: memref<32x128xf32, #tpu.memory_space<vmem>>, %arg5: memref<32x128xf32, #tpu.memory_space<vmem>>, %arg6: memref<1x128xf32, #tpu.memory_space<vmem>>, %arg7: memref<1x1x32xf32, #tpu.memory_space<vmem>>, %arg8: memref<1x1xf32, #tpu.memory_space<vmem>>, %arg9: memref<8x8xf32, #tpu.memory_space<vmem>>, %arg10: memref<64x128xf32, #tpu.memory_space<vmem>>, %arg11: memref<8x8x32xf32, #tpu.memory_space<vmem>>) attributes {dimension_semantics = [], scalar_prefetch = 0 : i64, scratch_operands = 2 : i64, tpu.core_type = #tpu.core_type<tc>} {
    %c0 = arith.constant 0 : index
    %c0_0 = arith.constant 0 : index
    %0 = vector.load %arg2[%c0, %c0_0] : memref<32x128xf32, #tpu.memory_space<vmem>>, vector<32x128xf32>
    %c0_1 = arith.constant 0 : index
    %c0_2 = arith.constant 0 : index
    %1 = vector.load %arg4[%c0_1, %c0_2] : memref<32x128xf32, #tpu.memory_space<vmem>>, vector<32x128xf32>
    %c0_3 = arith.constant 0 : index
    %c0_4 = arith.constant 0 : index
    %2 = vector.load %arg5[%c0_3, %c0_4] : memref<32x128xf32, #tpu.memory_space<vmem>>, vector<32x128xf32>
    %c0_5 = arith.constant 0 : index
    %c0_6 = arith.constant 0 : index
    %3 = vector.load %arg6[%c0_5, %c0_6] : memref<1x128xf32, #tpu.memory_space<vmem>>, vector<1x128xf32>
    %c0_7 = arith.constant 0 : index
    %c0_8 = arith.constant 0 : index
    %4 = vector.load %arg0[%c0_7, %c0_8] : memref<64x4xf32, #tpu.memory_space<vmem>>, vector<64x4xf32>
    %c0_9 = arith.constant 0 : index
    %c0_10 = arith.constant 0 : index
    %5 = vector.load %arg1[%c0_9, %c0_10] : memref<4x128xf32, #tpu.memory_space<vmem>>, vector<4x128xf32>
    %cst = arith.constant dense<0.000000e+00> : vector<64x128xf32>
    %6 = tpu.matmul %4, %5, %cst {dimension_numbers = #tpu.dot_dimension_numbers<[1], [0], [0], [1], [0, 0, 1, 1], [], []>} : vector<64x4xf32>, vector<4x128xf32>, vector<64x128xf32> -> vector<64x128xf32>
    %c0_11 = arith.constant 0 : index
    %c0_12 = arith.constant 0 : index
    %7 = vector.load %arg3[%c0_11, %c0_12] : memref<1x128xf32, #tpu.memory_space<vmem>>, vector<1x128xf32>
    %8 = vector.broadcast %7 : vector<1x128xf32> to vector<64x128xf32>
    %9 = arith.addf %6, %8 : vector<64x128xf32>
    %c0_13 = arith.constant 0 : index
    %c0_14 = arith.constant 0 : index
    %10 = vector.load %arg10[%c0_13, %c0_14] : memref<64x128xf32, #tpu.memory_space<vmem>>, vector<64x128xf32>
    tpu.vector_store %arg10[%c0_13, %c0_14], %9 {strides = array<i32>} : memref<64x128xf32, #tpu.memory_space<vmem>>, vector<64x128xf32>,
    %cst_15 = arith.constant 0.000000e+00 : f32
    %11 = vector.broadcast %cst_15 : f32 to vector<8x32xf32>
    %cst_16 = arith.constant 0.000000e+00 : f32
    %12 = vector.broadcast %cst_16 : f32 to vector<8x32xf32>
    %cst_17 = arith.constant 0.000000e+00 : f32
    %13 = vector.broadcast %cst_17 : f32 to vector<8x32xf32>
    %cst_18 = arith.constant 0.000000e+00 : f32
    %14 = vector.broadcast %cst_18 : f32 to vector<8x32xf32>
    %c0_19 = arith.constant 0 : index
    %c0_20 = arith.constant 0 : index
    %15 = vector.load %arg10[%c0_19, %c0_20] : memref<64x128xf32, #tpu.memory_space<vmem>>, vector<8x128xf32>
    %cst_21 = arith.constant dense<0.000000e+00> : vector<8x128xf32>
    %16 = tpu.matmul %11, %0, %cst_21 {dimension_numbers = #tpu.dot_dimension_numbers<[1], [0], [0], [1], [0, 0, 1, 1], [], []>} : vector<8x32xf32>, vector<32x128xf32>, vector<8x128xf32> -> vector<8x128xf32>
    %17 = arith.addf %15, %16 : vector<8x128xf32>
    %18 = vector.extract_strided_slice %17 {offsets = [0, 0], sizes = [8, 32], strides = [1, 1]} : vector<8x128xf32> to vector<8x32xf32>
    %19 = arith.negf %18 : vector<8x32xf32>
    %20 = math.exp %19 : vector<8x32xf32>
    %cst_22 = arith.constant 1.000000e+00 : f32
    %21 = vector.broadcast %cst_22 : f32 to vector<8x32xf32>
    %22 = arith.addf %21, %20 : vector<8x32xf32>
    %23 = arith.divf %21, %22 : vector<8x32xf32>
    %24 = vector.extract_strided_slice %17 {offsets = [0, 32], sizes = [8, 32], strides = [1, 1]} : vector<8x128xf32> to vector<8x32xf32>
    %25 = arith.negf %24 : vector<8x32xf32>
    %26 = math.exp %25 : vector<8x32xf32>
    %cst_23 = arith.constant 1.000000e+00 : f32
    %27 = vector.broadcast %cst_23 : f32 to vector<8x32xf32>
    %28 = arith.addf %27, %26 : vector<8x32xf32>
    %29 = arith.divf %27, %28 : vector<8x32xf32>
    %30 = vector.extract_strided_slice %17 {offsets = [0, 64], sizes = [8, 32], strides = [1, 1]} : vector<8x128xf32> to vector<8x32xf32>
    %31 = math.tanh %30 : vector<8x32xf32>
    %32 = vector.extract_strided_slice %17 {offsets = [0, 96], sizes = [8, 32], strides = [1, 1]} : vector<8x128xf32> to vector<8x32xf32>
    %33 = arith.negf %32 : vector<8x32xf32>
    %34 = math.exp %33 : vector<8x32xf32>
    %cst_24 = arith.constant 1.000000e+00 : f32
    %35 = vector.broadcast %cst_24 : f32 to vector<8x32xf32>
    %36 = arith.addf %35, %34 : vector<8x32xf32>
    %37 = arith.divf %35, %36 : vector<8x32xf32>
    %38 = arith.mulf %29, %12 : vector<8x32xf32>
    %39 = arith.mulf %23, %31 : vector<8x32xf32>
    %40 = arith.addf %38, %39 : vector<8x32xf32>
    %41 = math.tanh %40 : vector<8x32xf32>
    %42 = arith.mulf %37, %41 : vector<8x32xf32>
    %cst_25 = arith.constant dense<0.000000e+00> : vector<8x128xf32>
    %43 = tpu.matmul %42, %1, %cst_25 {dimension_numbers = #tpu.dot_dimension_numbers<[1], [0], [0], [1], [0, 0, 1, 1], [], []>} : vector<8x32xf32>, vector<32x128xf32>, vector<8x128xf32> -> vector<8x128xf32>
    %cst_26 = arith.constant dense<0.000000e+00> : vector<8x128xf32>
    %44 = tpu.matmul %13, %2, %cst_26 {dimension_numbers = #tpu.dot_dimension_numbers<[1], [0], [0], [1], [0, 0, 1, 1], [], []>} : vector<8x32xf32>, vector<32x128xf32>, vector<8x128xf32> -> vector<8x128xf32>
    %45 = arith.addf %43, %44 : vector<8x128xf32>
    %46 = vector.broadcast %3 : vector<1x128xf32> to vector<8x128xf32>
    %47 = arith.addf %45, %46 : vector<8x128xf32>
    %48 = vector.extract_strided_slice %47 {offsets = [0, 0], sizes = [8, 32], strides = [1, 1]} : vector<8x128xf32> to vector<8x32xf32>
    %49 = arith.negf %48 : vector<8x32xf32>
    %50 = math.exp %49 : vector<8x32xf32>
    %cst_27 = arith.constant 1.000000e+00 : f32
    %51 = vector.broadcast %cst_27 : f32 to vector<8x32xf32>
    %52 = arith.addf %51, %50 : vector<8x32xf32>
    %53 = arith.divf %51, %52 : vector<8x32xf32>
    %54 = vector.extract_strided_slice %47 {offsets = [0, 32], sizes = [8, 32], strides = [1, 1]} : vector<8x128xf32> to vector<8x32xf32>
    %55 = arith.negf %54 : vector<8x32xf32>
    %56 = math.exp %55 : vector<8x32xf32>
    %cst_28 = arith.constant 1.000000e+00 : f32
    %57 = vector.broadcast %cst_28 : f32 to vector<8x32xf32>
    %58 = arith.addf %57, %56 : vector<8x32xf32>
    %59 = arith.divf %57, %58 : vector<8x32xf32>
    %60 = vector.extract_strided_slice %47 {offsets = [0, 64], sizes = [8, 32], strides = [1, 1]} : vector<8x128xf32> to vector<8x32xf32>
    %61 = math.tanh %60 : vector<8x32xf32>
    %62 = vector.extract_strided_slice %47 {offsets = [0, 96], sizes = [8, 32], strides = [1, 1]} : vector<8x128xf32> to vector<8x32xf32>
    %63 = arith.negf %62 : vector<8x32xf32>
    %64 = math.exp %63 : vector<8x32xf32>
    %cst_29 = arith.constant 1.000000e+00 : f32
    %65 = vector.broadcast %cst_29 : f32 to vector<8x32xf32>
    %66 = arith.addf %65, %64 : vector<8x32xf32>
    %67 = arith.divf %65, %66 : vector<8x32xf32>
    %68 = arith.mulf %59, %14 : vector<8x32xf32>
    %69 = arith.mulf %53, %61 : vector<8x32xf32>
    %70 = arith.addf %68, %69 : vector<8x32xf32>
    %71 = math.tanh %70 : vector<8x32xf32>
    %72 = arith.mulf %67, %71 : vector<8x32xf32>
    %c0_30 = arith.constant 0 : index
    %c0_31 = arith.constant 0 : index
    %c0_32 = arith.constant 0 : index
    %73 = vector.load %arg11[%c0_30, %c0_31, %c0_32] : memref<8x8x32xf32, #tpu.memory_space<vmem>>, vector<1x8x32xf32>
    %74 = vector.shape_cast %73 : vector<1x8x32xf32> to vector<8x32xf32>
    %75 = vector.shape_cast %72 : vector<8x32xf32> to vector<1x8x32xf32>
    tpu.vector_store %arg11[%c0_30, %c0_31, %c0_32], %75 {strides = array<i32>} : memref<8x8x32xf32, #tpu.memory_space<vmem>>, vector<1x8x32xf32>,
    %c8 = arith.constant 8 : index
    %c0_33 = arith.constant 0 : index
    %76 = vector.load %arg10[%c8, %c0_33] : memref<64x128xf32, #tpu.memory_space<vmem>>, vector<8x128xf32>
    %cst_34 = arith.constant dense<0.000000e+00> : vector<8x128xf32>
    %77 = tpu.matmul %42, %0, %cst_34 {dimension_numbers = #tpu.dot_dimension_numbers<[1], [0], [0], [1], [0, 0, 1, 1], [], []>} : vector<8x32xf32>, vector<32x128xf32>, vector<8x128xf32> -> vector<8x128xf32>
    %78 = arith.addf %76, %77 : vector<8x128xf32>
    %79 = vector.extract_strided_slice %78 {offsets = [0, 0], sizes = [8, 32], strides = [1, 1]} : vector<8x128xf32> to vector<8x32xf32>
    %80 = arith.negf %79 : vector<8x32xf32>
    %81 = math.exp %80 : vector<8x32xf32>
    %cst_35 = arith.constant 1.000000e+00 : f32
    %82 = vector.broadcast %cst_35 : f32 to vector<8x32xf32>
    %83 = arith.addf %82, %81 : vector<8x32xf32>
    %84 = arith.divf %82, %83 : vector<8x32xf32>
    %85 = vector.extract_strided_slice %78 {offsets = [0, 32], sizes = [8, 32], strides = [1, 1]} : vector<8x128xf32> to vector<8x32xf32>
    %86 = arith.negf %85 : vector<8x32xf32>
    %87 = math.exp %86 : vector<8x32xf32>
    %cst_36 = arith.constant 1.000000e+00 : f32
    %88 = vector.broadcast %cst_36 : f32 to vector<8x32xf32>
    %89 = arith.addf %88, %87 : vector<8x32xf32>
    %90 = arith.divf %88, %89 : vector<8x32xf32>
    %91 = vector.extract_strided_slice %78 {offsets = [0, 64], sizes = [8, 32], strides = [1, 1]} : vector<8x128xf32> to vector<8x32xf32>
    %92 = math.tanh %91 : vector<8x32xf32>
    %93 = vector.extract_strided_slice %78 {offsets = [0, 96], sizes = [8, 32], strides = [1, 1]} : vector<8x128xf32> to vector<8x32xf32>
    %94 = arith.negf %93 : vector<8x32xf32>
    %95 = math.exp %94 : vector<8x32xf32>
    %cst_37 = arith.constant 1.000000e+00 : f32
    %96 = vector.broadcast %cst_37 : f32 to vector<8x32xf32>
    %97 = arith.addf %96, %95 : vector<8x32xf32>
    %98 = arith.divf %96, %97 : vector<8x32xf32>
    %99 = arith.mulf %90, %40 : vector<8x32xf32>
    %100 = arith.mulf %84, %92 : vector<8x32xf32>
    %101 = arith.addf %99, %100 : vector<8x32xf32>
    %102 = math.tanh %101 : vector<8x32xf32>
    %103 = arith.mulf %98, %102 : vector<8x32xf32>
    %cst_38 = arith.constant dense<0.000000e+00> : vector<8x128xf32>
    %104 = tpu.matmul %103, %1, %cst_38 {dimension_numbers = #tpu.dot_dimension_numbers<[1], [0], [0], [1], [0, 0, 1, 1], [], []>} : vector<8x32xf32>, vector<32x128xf32>, vector<8x128xf32> -> vector<8x128xf32>
    %cst_39 = arith.constant dense<0.000000e+00> : vector<8x128xf32>
    %105 = tpu.matmul %72, %2, %cst_39 {dimension_numbers = #tpu.dot_dimension_numbers<[1], [0], [0], [1], [0, 0, 1, 1], [], []>} : vector<8x32xf32>, vector<32x128xf32>, vector<8x128xf32> -> vector<8x128xf32>
    %106 = arith.addf %104, %105 : vector<8x128xf32>
    %107 = vector.broadcast %3 : vector<1x128xf32> to vector<8x128xf32>
    %108 = arith.addf %106, %107 : vector<8x128xf32>
    %109 = vector.extract_strided_slice %108 {offsets = [0, 0], sizes = [8, 32], strides = [1, 1]} : vector<8x128xf32> to vector<8x32xf32>
    %110 = arith.negf %109 : vector<8x32xf32>
    %111 = math.exp %110 : vector<8x32xf32>
    %cst_40 = arith.constant 1.000000e+00 : f32
    %112 = vector.broadcast %cst_40 : f32 to vector<8x32xf32>
    %113 = arith.addf %112, %111 : vector<8x32xf32>
    %114 = arith.divf %112, %113 : vector<8x32xf32>
    %115 = vector.extract_strided_slice %108 {offsets = [0, 32], sizes = [8, 32], strides = [1, 1]} : vector<8x128xf32> to vector<8x32xf32>
    %116 = arith.negf %115 : vector<8x32xf32>
    %117 = math.exp %116 : vector<8x32xf32>
    %cst_41 = arith.constant 1.000000e+00 : f32
    %118 = vector.broadcast %cst_41 : f32 to vector<8x32xf32>
    %119 = arith.addf %118, %117 : vector<8x32xf32>
    %120 = arith.divf %118, %119 : vector<8x32xf32>
    %121 = vector.extract_strided_slice %108 {offsets = [0, 64], sizes = [8, 32], strides = [1, 1]} : vector<8x128xf32> to vector<8x32xf32>
    %122 = math.tanh %121 : vector<8x32xf32>
    %123 = vector.extract_strided_slice %108 {offsets = [0, 96], sizes = [8, 32], strides = [1, 1]} : vector<8x128xf32> to vector<8x32xf32>
    %124 = arith.negf %123 : vector<8x32xf32>
    %125 = math.exp %124 : vector<8x32xf32>
    %cst_42 = arith.constant 1.000000e+00 : f32
    %126 = vector.broadcast %cst_42 : f32 to vector<8x32xf32>
    %127 = arith.addf %126, %125 : vector<8x32xf32>
    %128 = arith.divf %126, %127 : vector<8x32xf32>
    %129 = arith.mulf %120, %70 : vector<8x32xf32>
    %130 = arith.mulf %114, %122 : vector<8x32xf32>
    %131 = arith.addf %129, %130 : vector<8x32xf32>
    %132 = math.tanh %131 : vector<8x32xf32>
    %133 = arith.mulf %128, %132 : vector<8x32xf32>
    %c1 = arith.constant 1 : index
    %c0_43 = arith.constant 0 : index
    %c0_44 = arith.constant 0 : index
    %134 = vector.load %arg11[%c1, %c0_43, %c0_44] : memref<8x8x32xf32, #tpu.memory_space<vmem>>, vector<1x8x32xf32>
    %135 = vector.shape_cast %134 : vector<1x8x32xf32> to vector<8x32xf32>
    %136 = vector.shape_cast %133 : vector<8x32xf32> to vector<1x8x32xf32>
    tpu.vector_store %arg11[%c1, %c0_43, %c0_44], %136 {strides = array<i32>} : memref<8x8x32xf32, #tpu.memory_space<vmem>>, vector<1x8x32xf32>,
    %c16 = arith.constant 16 : index
    %c0_45 = arith.constant 0 : index
    %137 = vector.load %arg10[%c16, %c0_45] : memref<64x128xf32, #tpu.memory_space<vmem>>, vector<8x128xf32>
    %cst_46 = arith.constant dense<0.000000e+00> : vector<8x128xf32>
    %138 = tpu.matmul %103, %0, %cst_46 {dimension_numbers = #tpu.dot_dimension_numbers<[1], [0], [0], [1], [0, 0, 1, 1], [], []>} : vector<8x32xf32>, vector<32x128xf32>, vector<8x128xf32> -> vector<8x128xf32>
    %139 = arith.addf %137, %138 : vector<8x128xf32>
    %140 = vector.extract_strided_slice %139 {offsets = [0, 0], sizes = [8, 32], strides = [1, 1]} : vector<8x128xf32> to vector<8x32xf32>
    %141 = arith.negf %140 : vector<8x32xf32>
    %142 = math.exp %141 : vector<8x32xf32>
    %cst_47 = arith.constant 1.000000e+00 : f32
    %143 = vector.broadcast %cst_47 : f32 to vector<8x32xf32>
    %144 = arith.addf %143, %142 : vector<8x32xf32>
    %145 = arith.divf %143, %144 : vector<8x32xf32>
    %146 = vector.extract_strided_slice %139 {offsets = [0, 32], sizes = [8, 32], strides = [1, 1]} : vector<8x128xf32> to vector<8x32xf32>
    %147 = arith.negf %146 : vector<8x32xf32>
    %148 = math.exp %147 : vector<8x32xf32>
    %cst_48 = arith.constant 1.000000e+00 : f32
    %149 = vector.broadcast %cst_48 : f32 to vector<8x32xf32>
    %150 = arith.addf %149, %148 : vector<8x32xf32>
    %151 = arith.divf %149, %150 : vector<8x32xf32>
    %152 = vector.extract_strided_slice %139 {offsets = [0, 64], sizes = [8, 32], strides = [1, 1]} : vector<8x128xf32> to vector<8x32xf32>
    %153 = math.tanh %152 : vector<8x32xf32>
    %154 = vector.extract_strided_slice %139 {offsets = [0, 96], sizes = [8, 32], strides = [1, 1]} : vector<8x128xf32> to vector<8x32xf32>
    %155 = arith.negf %154 : vector<8x32xf32>
    %156 = math.exp %155 : vector<8x32xf32>
    %cst_49 = arith.constant 1.000000e+00 : f32
    %157 = vector.broadcast %cst_49 : f32 to vector<8x32xf32>
    %158 = arith.addf %157, %156 : vector<8x32xf32>
    %159 = arith.divf %157, %158 : vector<8x32xf32>
    %160 = arith.mulf %151, %101 : vector<8x32xf32>
    %161 = arith.mulf %145, %153 : vector<8x32xf32>
    %162 = arith.addf %160, %161 : vector<8x32xf32>
    %163 = math.tanh %162 : vector<8x32xf32>
    %164 = arith.mulf %159, %163 : vector<8x32xf32>
    %cst_50 = arith.constant dense<0.000000e+00> : vector<8x128xf32>
    %165 = tpu.matmul %164, %1, %cst_50 {dimension_numbers = #tpu.dot_dimension_numbers<[1], [0], [0], [1], [0, 0, 1, 1], [], []>} : vector<8x32xf32>, vector<32x128xf32>, vector<8x128xf32> -> vector<8x128xf32>
    %cst_51 = arith.constant dense<0.000000e+00> : vector<8x128xf32>
    %166 = tpu.matmul %133, %2, %cst_51 {dimension_numbers = #tpu.dot_dimension_numbers<[1], [0], [0], [1], [0, 0, 1, 1], [], []>} : vector<8x32xf32>, vector<32x128xf32>, vector<8x128xf32> -> vector<8x128xf32>
    %167 = arith.addf %165, %166 : vector<8x128xf32>
    %168 = vector.broadcast %3 : vector<1x128xf32> to vector<8x128xf32>
    %169 = arith.addf %167, %168 : vector<8x128xf32>
    %170 = vector.extract_strided_slice %169 {offsets = [0, 0], sizes = [8, 32], strides = [1, 1]} : vector<8x128xf32> to vector<8x32xf32>
    %171 = arith.negf %170 : vector<8x32xf32>
    %172 = math.exp %171 : vector<8x32xf32>
    %cst_52 = arith.constant 1.000000e+00 : f32
    %173 = vector.broadcast %cst_52 : f32 to vector<8x32xf32>
    %174 = arith.addf %173, %172 : vector<8x32xf32>
    %175 = arith.divf %173, %174 : vector<8x32xf32>
    %176 = vector.extract_strided_slice %169 {offsets = [0, 32], sizes = [8, 32], strides = [1, 1]} : vector<8x128xf32> to vector<8x32xf32>
    %177 = arith.negf %176 : vector<8x32xf32>
    %178 = math.exp %177 : vector<8x32xf32>
    %cst_53 = arith.constant 1.000000e+00 : f32
    %179 = vector.broadcast %cst_53 : f32 to vector<8x32xf32>
    %180 = arith.addf %179, %178 : vector<8x32xf32>
    %181 = arith.divf %179, %180 : vector<8x32xf32>
    %182 = vector.extract_strided_slice %169 {offsets = [0, 64], sizes = [8, 32], strides = [1, 1]} : vector<8x128xf32> to vector<8x32xf32>
    %183 = math.tanh %182 : vector<8x32xf32>
    %184 = vector.extract_strided_slice %169 {offsets = [0, 96], sizes = [8, 32], strides = [1, 1]} : vector<8x128xf32> to vector<8x32xf32>
    %185 = arith.negf %184 : vector<8x32xf32>
    %186 = math.exp %185 : vector<8x32xf32>
    %cst_54 = arith.constant 1.000000e+00 : f32
    %187 = vector.broadcast %cst_54 : f32 to vector<8x32xf32>
    %188 = arith.addf %187, %186 : vector<8x32xf32>
    %189 = arith.divf %187, %188 : vector<8x32xf32>
    %190 = arith.mulf %181, %131 : vector<8x32xf32>
    %191 = arith.mulf %175, %183 : vector<8x32xf32>
    %192 = arith.addf %190, %191 : vector<8x32xf32>
    %193 = math.tanh %192 : vector<8x32xf32>
    %194 = arith.mulf %189, %193 : vector<8x32xf32>
    %c2 = arith.constant 2 : index
    %c0_55 = arith.constant 0 : index
    %c0_56 = arith.constant 0 : index
    %195 = vector.load %arg11[%c2, %c0_55, %c0_56] : memref<8x8x32xf32, #tpu.memory_space<vmem>>, vector<1x8x32xf32>
    %196 = vector.shape_cast %195 : vector<1x8x32xf32> to vector<8x32xf32>
    %197 = vector.shape_cast %194 : vector<8x32xf32> to vector<1x8x32xf32>
    tpu.vector_store %arg11[%c2, %c0_55, %c0_56], %197 {strides = array<i32>} : memref<8x8x32xf32, #tpu.memory_space<vmem>>, vector<1x8x32xf32>,
    %c24 = arith.constant 24 : index
    %c0_57 = arith.constant 0 : index
    %198 = vector.load %arg10[%c24, %c0_57] : memref<64x128xf32, #tpu.memory_space<vmem>>, vector<8x128xf32>
    %cst_58 = arith.constant dense<0.000000e+00> : vector<8x128xf32>
    %199 = tpu.matmul %164, %0, %cst_58 {dimension_numbers = #tpu.dot_dimension_numbers<[1], [0], [0], [1], [0, 0, 1, 1], [], []>} : vector<8x32xf32>, vector<32x128xf32>, vector<8x128xf32> -> vector<8x128xf32>
    %200 = arith.addf %198, %199 : vector<8x128xf32>
    %201 = vector.extract_strided_slice %200 {offsets = [0, 0], sizes = [8, 32], strides = [1, 1]} : vector<8x128xf32> to vector<8x32xf32>
    %202 = arith.negf %201 : vector<8x32xf32>
    %203 = math.exp %202 : vector<8x32xf32>
    %cst_59 = arith.constant 1.000000e+00 : f32
    %204 = vector.broadcast %cst_59 : f32 to vector<8x32xf32>
    %205 = arith.addf %204, %203 : vector<8x32xf32>
    %206 = arith.divf %204, %205 : vector<8x32xf32>
    %207 = vector.extract_strided_slice %200 {offsets = [0, 32], sizes = [8, 32], strides = [1, 1]} : vector<8x128xf32> to vector<8x32xf32>
    %208 = arith.negf %207 : vector<8x32xf32>
    %209 = math.exp %208 : vector<8x32xf32>
    %cst_60 = arith.constant 1.000000e+00 : f32
    %210 = vector.broadcast %cst_60 : f32 to vector<8x32xf32>
    %211 = arith.addf %210, %209 : vector<8x32xf32>
    %212 = arith.divf %210, %211 : vector<8x32xf32>
    %213 = vector.extract_strided_slice %200 {offsets = [0, 64], sizes = [8, 32], strides = [1, 1]} : vector<8x128xf32> to vector<8x32xf32>
    %214 = math.tanh %213 : vector<8x32xf32>
    %215 = vector.extract_strided_slice %200 {offsets = [0, 96], sizes = [8, 32], strides = [1, 1]} : vector<8x128xf32> to vector<8x32xf32>
    %216 = arith.negf %215 : vector<8x32xf32>
    %217 = math.exp %216 : vector<8x32xf32>
    %cst_61 = arith.constant 1.000000e+00 : f32
    %218 = vector.broadcast %cst_61 : f32 to vector<8x32xf32>
    %219 = arith.addf %218, %217 : vector<8x32xf32>
    %220 = arith.divf %218, %219 : vector<8x32xf32>
    %221 = arith.mulf %212, %162 : vector<8x32xf32>
    %222 = arith.mulf %206, %214 : vector<8x32xf32>
    %223 = arith.addf %221, %222 : vector<8x32xf32>
    %224 = math.tanh %223 : vector<8x32xf32>
    %225 = arith.mulf %220, %224 : vector<8x32xf32>
    %cst_62 = arith.constant dense<0.000000e+00> : vector<8x128xf32>
    %226 = tpu.matmul %225, %1, %cst_62 {dimension_numbers = #tpu.dot_dimension_numbers<[1], [0], [0], [1], [0, 0, 1, 1], [], []>} : vector<8x32xf32>, vector<32x128xf32>, vector<8x128xf32> -> vector<8x128xf32>
    %cst_63 = arith.constant dense<0.000000e+00> : vector<8x128xf32>
    %227 = tpu.matmul %194, %2, %cst_63 {dimension_numbers = #tpu.dot_dimension_numbers<[1], [0], [0], [1], [0, 0, 1, 1], [], []>} : vector<8x32xf32>, vector<32x128xf32>, vector<8x128xf32> -> vector<8x128xf32>
    %228 = arith.addf %226, %227 : vector<8x128xf32>
    %229 = vector.broadcast %3 : vector<1x128xf32> to vector<8x128xf32>
    %230 = arith.addf %228, %229 : vector<8x128xf32>
    %231 = vector.extract_strided_slice %230 {offsets = [0, 0], sizes = [8, 32], strides = [1, 1]} : vector<8x128xf32> to vector<8x32xf32>
    %232 = arith.negf %231 : vector<8x32xf32>
    %233 = math.exp %232 : vector<8x32xf32>
    %cst_64 = arith.constant 1.000000e+00 : f32
    %234 = vector.broadcast %cst_64 : f32 to vector<8x32xf32>
    %235 = arith.addf %234, %233 : vector<8x32xf32>
    %236 = arith.divf %234, %235 : vector<8x32xf32>
    %237 = vector.extract_strided_slice %230 {offsets = [0, 32], sizes = [8, 32], strides = [1, 1]} : vector<8x128xf32> to vector<8x32xf32>
    %238 = arith.negf %237 : vector<8x32xf32>
    %239 = math.exp %238 : vector<8x32xf32>
    %cst_65 = arith.constant 1.000000e+00 : f32
    %240 = vector.broadcast %cst_65 : f32 to vector<8x32xf32>
    %241 = arith.addf %240, %239 : vector<8x32xf32>
    %242 = arith.divf %240, %241 : vector<8x32xf32>
    %243 = vector.extract_strided_slice %230 {offsets = [0, 64], sizes = [8, 32], strides = [1, 1]} : vector<8x128xf32> to vector<8x32xf32>
    %244 = math.tanh %243 : vector<8x32xf32>
    %245 = vector.extract_strided_slice %230 {offsets = [0, 96], sizes = [8, 32], strides = [1, 1]} : vector<8x128xf32> to vector<8x32xf32>
    %246 = arith.negf %245 : vector<8x32xf32>
    %247 = math.exp %246 : vector<8x32xf32>
    %cst_66 = arith.constant 1.000000e+00 : f32
    %248 = vector.broadcast %cst_66 : f32 to vector<8x32xf32>
    %249 = arith.addf %248, %247 : vector<8x32xf32>
    %250 = arith.divf %248, %249 : vector<8x32xf32>
    %251 = arith.mulf %242, %192 : vector<8x32xf32>
    %252 = arith.mulf %236, %244 : vector<8x32xf32>
    %253 = arith.addf %251, %252 : vector<8x32xf32>
    %254 = math.tanh %253 : vector<8x32xf32>
    %255 = arith.mulf %250, %254 : vector<8x32xf32>
    %c3 = arith.constant 3 : index
    %c0_67 = arith.constant 0 : index
    %c0_68 = arith.constant 0 : index
    %256 = vector.load %arg11[%c3, %c0_67, %c0_68] : memref<8x8x32xf32, #tpu.memory_space<vmem>>, vector<1x8x32xf32>
    %257 = vector.shape_cast %256 : vector<1x8x32xf32> to vector<8x32xf32>
    %258 = vector.shape_cast %255 : vector<8x32xf32> to vector<1x8x32xf32>
    tpu.vector_store %arg11[%c3, %c0_67, %c0_68], %258 {strides = array<i32>} : memref<8x8x32xf32, #tpu.memory_space<vmem>>, vector<1x8x32xf32>,
    %c32 = arith.constant 32 : index
    %c0_69 = arith.constant 0 : index
    %259 = vector.load %arg10[%c32, %c0_69] : memref<64x128xf32, #tpu.memory_space<vmem>>, vector<8x128xf32>
    %cst_70 = arith.constant dense<0.000000e+00> : vector<8x128xf32>
    %260 = tpu.matmul %225, %0, %cst_70 {dimension_numbers = #tpu.dot_dimension_numbers<[1], [0], [0], [1], [0, 0, 1, 1], [], []>} : vector<8x32xf32>, vector<32x128xf32>, vector<8x128xf32> -> vector<8x128xf32>
    %261 = arith.addf %259, %260 : vector<8x128xf32>
    %262 = vector.extract_strided_slice %261 {offsets = [0, 0], sizes = [8, 32], strides = [1, 1]} : vector<8x128xf32> to vector<8x32xf32>
    %263 = arith.negf %262 : vector<8x32xf32>
    %264 = math.exp %263 : vector<8x32xf32>
    %cst_71 = arith.constant 1.000000e+00 : f32
    %265 = vector.broadcast %cst_71 : f32 to vector<8x32xf32>
    %266 = arith.addf %265, %264 : vector<8x32xf32>
    %267 = arith.divf %265, %266 : vector<8x32xf32>
    %268 = vector.extract_strided_slice %261 {offsets = [0, 32], sizes = [8, 32], strides = [1, 1]} : vector<8x128xf32> to vector<8x32xf32>
    %269 = arith.negf %268 : vector<8x32xf32>
    %270 = math.exp %269 : vector<8x32xf32>
    %cst_72 = arith.constant 1.000000e+00 : f32
    %271 = vector.broadcast %cst_72 : f32 to vector<8x32xf32>
    %272 = arith.addf %271, %270 : vector<8x32xf32>
    %273 = arith.divf %271, %272 : vector<8x32xf32>
    %274 = vector.extract_strided_slice %261 {offsets = [0, 64], sizes = [8, 32], strides = [1, 1]} : vector<8x128xf32> to vector<8x32xf32>
    %275 = math.tanh %274 : vector<8x32xf32>
    %276 = vector.extract_strided_slice %261 {offsets = [0, 96], sizes = [8, 32], strides = [1, 1]} : vector<8x128xf32> to vector<8x32xf32>
    %277 = arith.negf %276 : vector<8x32xf32>
    %278 = math.exp %277 : vector<8x32xf32>
    %cst_73 = arith.constant 1.000000e+00 : f32
    %279 = vector.broadcast %cst_73 : f32 to vector<8x32xf32>
    %280 = arith.addf %279, %278 : vector<8x32xf32>
    %281 = arith.divf %279, %280 : vector<8x32xf32>
    %282 = arith.mulf %273, %223 : vector<8x32xf32>
    %283 = arith.mulf %267, %275 : vector<8x32xf32>
    %284 = arith.addf %282, %283 : vector<8x32xf32>
    %285 = math.tanh %284 : vector<8x32xf32>
    %286 = arith.mulf %281, %285 : vector<8x32xf32>
    %cst_74 = arith.constant dense<0.000000e+00> : vector<8x128xf32>
    %287 = tpu.matmul %286, %1, %cst_74 {dimension_numbers = #tpu.dot_dimension_numbers<[1], [0], [0], [1], [0, 0, 1, 1], [], []>} : vector<8x32xf32>, vector<32x128xf32>, vector<8x128xf32> -> vector<8x128xf32>
    %cst_75 = arith.constant dense<0.000000e+00> : vector<8x128xf32>
    %288 = tpu.matmul %255, %2, %cst_75 {dimension_numbers = #tpu.dot_dimension_numbers<[1], [0], [0], [1], [0, 0, 1, 1], [], []>} : vector<8x32xf32>, vector<32x128xf32>, vector<8x128xf32> -> vector<8x128xf32>
    %289 = arith.addf %287, %288 : vector<8x128xf32>
    %290 = vector.broadcast %3 : vector<1x128xf32> to vector<8x128xf32>
    %291 = arith.addf %289, %290 : vector<8x128xf32>
    %292 = vector.extract_strided_slice %291 {offsets = [0, 0], sizes = [8, 32], strides = [1, 1]} : vector<8x128xf32> to vector<8x32xf32>
    %293 = arith.negf %292 : vector<8x32xf32>
    %294 = math.exp %293 : vector<8x32xf32>
    %cst_76 = arith.constant 1.000000e+00 : f32
    %295 = vector.broadcast %cst_76 : f32 to vector<8x32xf32>
    %296 = arith.addf %295, %294 : vector<8x32xf32>
    %297 = arith.divf %295, %296 : vector<8x32xf32>
    %298 = vector.extract_strided_slice %291 {offsets = [0, 32], sizes = [8, 32], strides = [1, 1]} : vector<8x128xf32> to vector<8x32xf32>
    %299 = arith.negf %298 : vector<8x32xf32>
    %300 = math.exp %299 : vector<8x32xf32>
    %cst_77 = arith.constant 1.000000e+00 : f32
    %301 = vector.broadcast %cst_77 : f32 to vector<8x32xf32>
    %302 = arith.addf %301, %300 : vector<8x32xf32>
    %303 = arith.divf %301, %302 : vector<8x32xf32>
    %304 = vector.extract_strided_slice %291 {offsets = [0, 64], sizes = [8, 32], strides = [1, 1]} : vector<8x128xf32> to vector<8x32xf32>
    %305 = math.tanh %304 : vector<8x32xf32>
    %306 = vector.extract_strided_slice %291 {offsets = [0, 96], sizes = [8, 32], strides = [1, 1]} : vector<8x128xf32> to vector<8x32xf32>
    %307 = arith.negf %306 : vector<8x32xf32>
    %308 = math.exp %307 : vector<8x32xf32>
    %cst_78 = arith.constant 1.000000e+00 : f32
    %309 = vector.broadcast %cst_78 : f32 to vector<8x32xf32>
    %310 = arith.addf %309, %308 : vector<8x32xf32>
    %311 = arith.divf %309, %310 : vector<8x32xf32>
    %312 = arith.mulf %303, %253 : vector<8x32xf32>
    %313 = arith.mulf %297, %305 : vector<8x32xf32>
    %314 = arith.addf %312, %313 : vector<8x32xf32>
    %315 = math.tanh %314 : vector<8x32xf32>
    %316 = arith.mulf %311, %315 : vector<8x32xf32>
    %c4 = arith.constant 4 : index
    %c0_79 = arith.constant 0 : index
    %c0_80 = arith.constant 0 : index
    %317 = vector.load %arg11[%c4, %c0_79, %c0_80] : memref<8x8x32xf32, #tpu.memory_space<vmem>>, vector<1x8x32xf32>
    %318 = vector.shape_cast %317 : vector<1x8x32xf32> to vector<8x32xf32>
    %319 = vector.shape_cast %316 : vector<8x32xf32> to vector<1x8x32xf32>
    tpu.vector_store %arg11[%c4, %c0_79, %c0_80], %319 {strides = array<i32>} : memref<8x8x32xf32, #tpu.memory_space<vmem>>, vector<1x8x32xf32>,
    %c40 = arith.constant 40 : index
    %c0_81 = arith.constant 0 : index
    %320 = vector.load %arg10[%c40, %c0_81] : memref<64x128xf32, #tpu.memory_space<vmem>>, vector<8x128xf32>
    %cst_82 = arith.constant dense<0.000000e+00> : vector<8x128xf32>
    %321 = tpu.matmul %286, %0, %cst_82 {dimension_numbers = #tpu.dot_dimension_numbers<[1], [0], [0], [1], [0, 0, 1, 1], [], []>} : vector<8x32xf32>, vector<32x128xf32>, vector<8x128xf32> -> vector<8x128xf32>
    %322 = arith.addf %320, %321 : vector<8x128xf32>
    %323 = vector.extract_strided_slice %322 {offsets = [0, 0], sizes = [8, 32], strides = [1, 1]} : vector<8x128xf32> to vector<8x32xf32>
    %324 = arith.negf %323 : vector<8x32xf32>
    %325 = math.exp %324 : vector<8x32xf32>
    %cst_83 = arith.constant 1.000000e+00 : f32
    %326 = vector.broadcast %cst_83 : f32 to vector<8x32xf32>
    %327 = arith.addf %326, %325 : vector<8x32xf32>
    %328 = arith.divf %326, %327 : vector<8x32xf32>
    %329 = vector.extract_strided_slice %322 {offsets = [0, 32], sizes = [8, 32], strides = [1, 1]} : vector<8x128xf32> to vector<8x32xf32>
    %330 = arith.negf %329 : vector<8x32xf32>
    %331 = math.exp %330 : vector<8x32xf32>
    %cst_84 = arith.constant 1.000000e+00 : f32
    %332 = vector.broadcast %cst_84 : f32 to vector<8x32xf32>
    %333 = arith.addf %332, %331 : vector<8x32xf32>
    %334 = arith.divf %332, %333 : vector<8x32xf32>
    %335 = vector.extract_strided_slice %322 {offsets = [0, 64], sizes = [8, 32], strides = [1, 1]} : vector<8x128xf32> to vector<8x32xf32>
    %336 = math.tanh %335 : vector<8x32xf32>
    %337 = vector.extract_strided_slice %322 {offsets = [0, 96], sizes = [8, 32], strides = [1, 1]} : vector<8x128xf32> to vector<8x32xf32>
    %338 = arith.negf %337 : vector<8x32xf32>
    %339 = math.exp %338 : vector<8x32xf32>
    %cst_85 = arith.constant 1.000000e+00 : f32
    %340 = vector.broadcast %cst_85 : f32 to vector<8x32xf32>
    %341 = arith.addf %340, %339 : vector<8x32xf32>
    %342 = arith.divf %340, %341 : vector<8x32xf32>
    %343 = arith.mulf %334, %284 : vector<8x32xf32>
    %344 = arith.mulf %328, %336 : vector<8x32xf32>
    %345 = arith.addf %343, %344 : vector<8x32xf32>
    %346 = math.tanh %345 : vector<8x32xf32>
    %347 = arith.mulf %342, %346 : vector<8x32xf32>
    %cst_86 = arith.constant dense<0.000000e+00> : vector<8x128xf32>
    %348 = tpu.matmul %347, %1, %cst_86 {dimension_numbers = #tpu.dot_dimension_numbers<[1], [0], [0], [1], [0, 0, 1, 1], [], []>} : vector<8x32xf32>, vector<32x128xf32>, vector<8x128xf32> -> vector<8x128xf32>
    %cst_87 = arith.constant dense<0.000000e+00> : vector<8x128xf32>
    %349 = tpu.matmul %316, %2, %cst_87 {dimension_numbers = #tpu.dot_dimension_numbers<[1], [0], [0], [1], [0, 0, 1, 1], [], []>} : vector<8x32xf32>, vector<32x128xf32>, vector<8x128xf32> -> vector<8x128xf32>
    %350 = arith.addf %348, %349 : vector<8x128xf32>
    %351 = vector.broadcast %3 : vector<1x128xf32> to vector<8x128xf32>
    %352 = arith.addf %350, %351 : vector<8x128xf32>
    %353 = vector.extract_strided_slice %352 {offsets = [0, 0], sizes = [8, 32], strides = [1, 1]} : vector<8x128xf32> to vector<8x32xf32>
    %354 = arith.negf %353 : vector<8x32xf32>
    %355 = math.exp %354 : vector<8x32xf32>
    %cst_88 = arith.constant 1.000000e+00 : f32
    %356 = vector.broadcast %cst_88 : f32 to vector<8x32xf32>
    %357 = arith.addf %356, %355 : vector<8x32xf32>
    %358 = arith.divf %356, %357 : vector<8x32xf32>
    %359 = vector.extract_strided_slice %352 {offsets = [0, 32], sizes = [8, 32], strides = [1, 1]} : vector<8x128xf32> to vector<8x32xf32>
    %360 = arith.negf %359 : vector<8x32xf32>
    %361 = math.exp %360 : vector<8x32xf32>
    %cst_89 = arith.constant 1.000000e+00 : f32
    %362 = vector.broadcast %cst_89 : f32 to vector<8x32xf32>
    %363 = arith.addf %362, %361 : vector<8x32xf32>
    %364 = arith.divf %362, %363 : vector<8x32xf32>
    %365 = vector.extract_strided_slice %352 {offsets = [0, 64], sizes = [8, 32], strides = [1, 1]} : vector<8x128xf32> to vector<8x32xf32>
    %366 = math.tanh %365 : vector<8x32xf32>
    %367 = vector.extract_strided_slice %352 {offsets = [0, 96], sizes = [8, 32], strides = [1, 1]} : vector<8x128xf32> to vector<8x32xf32>
    %368 = arith.negf %367 : vector<8x32xf32>
    %369 = math.exp %368 : vector<8x32xf32>
    %cst_90 = arith.constant 1.000000e+00 : f32
    %370 = vector.broadcast %cst_90 : f32 to vector<8x32xf32>
    %371 = arith.addf %370, %369 : vector<8x32xf32>
    %372 = arith.divf %370, %371 : vector<8x32xf32>
    %373 = arith.mulf %364, %314 : vector<8x32xf32>
    %374 = arith.mulf %358, %366 : vector<8x32xf32>
    %375 = arith.addf %373, %374 : vector<8x32xf32>
    %376 = math.tanh %375 : vector<8x32xf32>
    %377 = arith.mulf %372, %376 : vector<8x32xf32>
    %c5 = arith.constant 5 : index
    %c0_91 = arith.constant 0 : index
    %c0_92 = arith.constant 0 : index
    %378 = vector.load %arg11[%c5, %c0_91, %c0_92] : memref<8x8x32xf32, #tpu.memory_space<vmem>>, vector<1x8x32xf32>
    %379 = vector.shape_cast %378 : vector<1x8x32xf32> to vector<8x32xf32>
    %380 = vector.shape_cast %377 : vector<8x32xf32> to vector<1x8x32xf32>
    tpu.vector_store %arg11[%c5, %c0_91, %c0_92], %380 {strides = array<i32>} : memref<8x8x32xf32, #tpu.memory_space<vmem>>, vector<1x8x32xf32>,
    %c48 = arith.constant 48 : index
    %c0_93 = arith.constant 0 : index
    %381 = vector.load %arg10[%c48, %c0_93] : memref<64x128xf32, #tpu.memory_space<vmem>>, vector<8x128xf32>
    %cst_94 = arith.constant dense<0.000000e+00> : vector<8x128xf32>
    %382 = tpu.matmul %347, %0, %cst_94 {dimension_numbers = #tpu.dot_dimension_numbers<[1], [0], [0], [1], [0, 0, 1, 1], [], []>} : vector<8x32xf32>, vector<32x128xf32>, vector<8x128xf32> -> vector<8x128xf32>
    %383 = arith.addf %381, %382 : vector<8x128xf32>
    %384 = vector.extract_strided_slice %383 {offsets = [0, 0], sizes = [8, 32], strides = [1, 1]} : vector<8x128xf32> to vector<8x32xf32>
    %385 = arith.negf %384 : vector<8x32xf32>
    %386 = math.exp %385 : vector<8x32xf32>
    %cst_95 = arith.constant 1.000000e+00 : f32
    %387 = vector.broadcast %cst_95 : f32 to vector<8x32xf32>
    %388 = arith.addf %387, %386 : vector<8x32xf32>
    %389 = arith.divf %387, %388 : vector<8x32xf32>
    %390 = vector.extract_strided_slice %383 {offsets = [0, 32], sizes = [8, 32], strides = [1, 1]} : vector<8x128xf32> to vector<8x32xf32>
    %391 = arith.negf %390 : vector<8x32xf32>
    %392 = math.exp %391 : vector<8x32xf32>
    %cst_96 = arith.constant 1.000000e+00 : f32
    %393 = vector.broadcast %cst_96 : f32 to vector<8x32xf32>
    %394 = arith.addf %393, %392 : vector<8x32xf32>
    %395 = arith.divf %393, %394 : vector<8x32xf32>
    %396 = vector.extract_strided_slice %383 {offsets = [0, 64], sizes = [8, 32], strides = [1, 1]} : vector<8x128xf32> to vector<8x32xf32>
    %397 = math.tanh %396 : vector<8x32xf32>
    %398 = vector.extract_strided_slice %383 {offsets = [0, 96], sizes = [8, 32], strides = [1, 1]} : vector<8x128xf32> to vector<8x32xf32>
    %399 = arith.negf %398 : vector<8x32xf32>
    %400 = math.exp %399 : vector<8x32xf32>
    %cst_97 = arith.constant 1.000000e+00 : f32
    %401 = vector.broadcast %cst_97 : f32 to vector<8x32xf32>
    %402 = arith.addf %401, %400 : vector<8x32xf32>
    %403 = arith.divf %401, %402 : vector<8x32xf32>
    %404 = arith.mulf %395, %345 : vector<8x32xf32>
    %405 = arith.mulf %389, %397 : vector<8x32xf32>
    %406 = arith.addf %404, %405 : vector<8x32xf32>
    %407 = math.tanh %406 : vector<8x32xf32>
    %408 = arith.mulf %403, %407 : vector<8x32xf32>
    %cst_98 = arith.constant dense<0.000000e+00> : vector<8x128xf32>
    %409 = tpu.matmul %408, %1, %cst_98 {dimension_numbers = #tpu.dot_dimension_numbers<[1], [0], [0], [1], [0, 0, 1, 1], [], []>} : vector<8x32xf32>, vector<32x128xf32>, vector<8x128xf32> -> vector<8x128xf32>
    %cst_99 = arith.constant dense<0.000000e+00> : vector<8x128xf32>
    %410 = tpu.matmul %377, %2, %cst_99 {dimension_numbers = #tpu.dot_dimension_numbers<[1], [0], [0], [1], [0, 0, 1, 1], [], []>} : vector<8x32xf32>, vector<32x128xf32>, vector<8x128xf32> -> vector<8x128xf32>
    %411 = arith.addf %409, %410 : vector<8x128xf32>
    %412 = vector.broadcast %3 : vector<1x128xf32> to vector<8x128xf32>
    %413 = arith.addf %411, %412 : vector<8x128xf32>
    %414 = vector.extract_strided_slice %413 {offsets = [0, 0], sizes = [8, 32], strides = [1, 1]} : vector<8x128xf32> to vector<8x32xf32>
    %415 = arith.negf %414 : vector<8x32xf32>
    %416 = math.exp %415 : vector<8x32xf32>
    %cst_100 = arith.constant 1.000000e+00 : f32
    %417 = vector.broadcast %cst_100 : f32 to vector<8x32xf32>
    %418 = arith.addf %417, %416 : vector<8x32xf32>
    %419 = arith.divf %417, %418 : vector<8x32xf32>
    %420 = vector.extract_strided_slice %413 {offsets = [0, 32], sizes = [8, 32], strides = [1, 1]} : vector<8x128xf32> to vector<8x32xf32>
    %421 = arith.negf %420 : vector<8x32xf32>
    %422 = math.exp %421 : vector<8x32xf32>
    %cst_101 = arith.constant 1.000000e+00 : f32
    %423 = vector.broadcast %cst_101 : f32 to vector<8x32xf32>
    %424 = arith.addf %423, %422 : vector<8x32xf32>
    %425 = arith.divf %423, %424 : vector<8x32xf32>
    %426 = vector.extract_strided_slice %413 {offsets = [0, 64], sizes = [8, 32], strides = [1, 1]} : vector<8x128xf32> to vector<8x32xf32>
    %427 = math.tanh %426 : vector<8x32xf32>
    %428 = vector.extract_strided_slice %413 {offsets = [0, 96], sizes = [8, 32], strides = [1, 1]} : vector<8x128xf32> to vector<8x32xf32>
    %429 = arith.negf %428 : vector<8x32xf32>
    %430 = math.exp %429 : vector<8x32xf32>
    %cst_102 = arith.constant 1.000000e+00 : f32
    %431 = vector.broadcast %cst_102 : f32 to vector<8x32xf32>
    %432 = arith.addf %431, %430 : vector<8x32xf32>
    %433 = arith.divf %431, %432 : vector<8x32xf32>
    %434 = arith.mulf %425, %375 : vector<8x32xf32>
    %435 = arith.mulf %419, %427 : vector<8x32xf32>
    %436 = arith.addf %434, %435 : vector<8x32xf32>
    %437 = math.tanh %436 : vector<8x32xf32>
    %438 = arith.mulf %433, %437 : vector<8x32xf32>
    %c6 = arith.constant 6 : index
    %c0_103 = arith.constant 0 : index
    %c0_104 = arith.constant 0 : index
    %439 = vector.load %arg11[%c6, %c0_103, %c0_104] : memref<8x8x32xf32, #tpu.memory_space<vmem>>, vector<1x8x32xf32>
    %440 = vector.shape_cast %439 : vector<1x8x32xf32> to vector<8x32xf32>
    %441 = vector.shape_cast %438 : vector<8x32xf32> to vector<1x8x32xf32>
    tpu.vector_store %arg11[%c6, %c0_103, %c0_104], %441 {strides = array<i32>} : memref<8x8x32xf32, #tpu.memory_space<vmem>>, vector<1x8x32xf32>,
    %c56 = arith.constant 56 : index
    %c0_105 = arith.constant 0 : index
    %442 = vector.load %arg10[%c56, %c0_105] : memref<64x128xf32, #tpu.memory_space<vmem>>, vector<8x128xf32>
    %cst_106 = arith.constant dense<0.000000e+00> : vector<8x128xf32>
    %443 = tpu.matmul %408, %0, %cst_106 {dimension_numbers = #tpu.dot_dimension_numbers<[1], [0], [0], [1], [0, 0, 1, 1], [], []>} : vector<8x32xf32>, vector<32x128xf32>, vector<8x128xf32> -> vector<8x128xf32>
    %444 = arith.addf %442, %443 : vector<8x128xf32>
    %445 = vector.extract_strided_slice %444 {offsets = [0, 0], sizes = [8, 32], strides = [1, 1]} : vector<8x128xf32> to vector<8x32xf32>
    %446 = arith.negf %445 : vector<8x32xf32>
    %447 = math.exp %446 : vector<8x32xf32>
    %cst_107 = arith.constant 1.000000e+00 : f32
    %448 = vector.broadcast %cst_107 : f32 to vector<8x32xf32>
    %449 = arith.addf %448, %447 : vector<8x32xf32>
    %450 = arith.divf %448, %449 : vector<8x32xf32>
    %451 = vector.extract_strided_slice %444 {offsets = [0, 32], sizes = [8, 32], strides = [1, 1]} : vector<8x128xf32> to vector<8x32xf32>
    %452 = arith.negf %451 : vector<8x32xf32>
    %453 = math.exp %452 : vector<8x32xf32>
    %cst_108 = arith.constant 1.000000e+00 : f32
    %454 = vector.broadcast %cst_108 : f32 to vector<8x32xf32>
    %455 = arith.addf %454, %453 : vector<8x32xf32>
    %456 = arith.divf %454, %455 : vector<8x32xf32>
    %457 = vector.extract_strided_slice %444 {offsets = [0, 64], sizes = [8, 32], strides = [1, 1]} : vector<8x128xf32> to vector<8x32xf32>
    %458 = math.tanh %457 : vector<8x32xf32>
    %459 = vector.extract_strided_slice %444 {offsets = [0, 96], sizes = [8, 32], strides = [1, 1]} : vector<8x128xf32> to vector<8x32xf32>
    %460 = arith.negf %459 : vector<8x32xf32>
    %461 = math.exp %460 : vector<8x32xf32>
    %cst_109 = arith.constant 1.000000e+00 : f32
    %462 = vector.broadcast %cst_109 : f32 to vector<8x32xf32>
    %463 = arith.addf %462, %461 : vector<8x32xf32>
    %464 = arith.divf %462, %463 : vector<8x32xf32>
    %465 = arith.mulf %456, %406 : vector<8x32xf32>
    %466 = arith.mulf %450, %458 : vector<8x32xf32>
    %467 = arith.addf %465, %466 : vector<8x32xf32>
    %468 = math.tanh %467 : vector<8x32xf32>
    %469 = arith.mulf %464, %468 : vector<8x32xf32>
    %cst_110 = arith.constant dense<0.000000e+00> : vector<8x128xf32>
    %470 = tpu.matmul %469, %1, %cst_110 {dimension_numbers = #tpu.dot_dimension_numbers<[1], [0], [0], [1], [0, 0, 1, 1], [], []>} : vector<8x32xf32>, vector<32x128xf32>, vector<8x128xf32> -> vector<8x128xf32>
    %cst_111 = arith.constant dense<0.000000e+00> : vector<8x128xf32>
    %471 = tpu.matmul %438, %2, %cst_111 {dimension_numbers = #tpu.dot_dimension_numbers<[1], [0], [0], [1], [0, 0, 1, 1], [], []>} : vector<8x32xf32>, vector<32x128xf32>, vector<8x128xf32> -> vector<8x128xf32>
    %472 = arith.addf %470, %471 : vector<8x128xf32>
    %473 = vector.broadcast %3 : vector<1x128xf32> to vector<8x128xf32>
    %474 = arith.addf %472, %473 : vector<8x128xf32>
    %475 = vector.extract_strided_slice %474 {offsets = [0, 0], sizes = [8, 32], strides = [1, 1]} : vector<8x128xf32> to vector<8x32xf32>
    %476 = arith.negf %475 : vector<8x32xf32>
    %477 = math.exp %476 : vector<8x32xf32>
    %cst_112 = arith.constant 1.000000e+00 : f32
    %478 = vector.broadcast %cst_112 : f32 to vector<8x32xf32>
    %479 = arith.addf %478, %477 : vector<8x32xf32>
    %480 = arith.divf %478, %479 : vector<8x32xf32>
    %481 = vector.extract_strided_slice %474 {offsets = [0, 32], sizes = [8, 32], strides = [1, 1]} : vector<8x128xf32> to vector<8x32xf32>
    %482 = arith.negf %481 : vector<8x32xf32>
    %483 = math.exp %482 : vector<8x32xf32>
    %cst_113 = arith.constant 1.000000e+00 : f32
    %484 = vector.broadcast %cst_113 : f32 to vector<8x32xf32>
    %485 = arith.addf %484, %483 : vector<8x32xf32>
    %486 = arith.divf %484, %485 : vector<8x32xf32>
    %487 = vector.extract_strided_slice %474 {offsets = [0, 64], sizes = [8, 32], strides = [1, 1]} : vector<8x128xf32> to vector<8x32xf32>
    %488 = math.tanh %487 : vector<8x32xf32>
    %489 = vector.extract_strided_slice %474 {offsets = [0, 96], sizes = [8, 32], strides = [1, 1]} : vector<8x128xf32> to vector<8x32xf32>
    %490 = arith.negf %489 : vector<8x32xf32>
    %491 = math.exp %490 : vector<8x32xf32>
    %cst_114 = arith.constant 1.000000e+00 : f32
    %492 = vector.broadcast %cst_114 : f32 to vector<8x32xf32>
    %493 = arith.addf %492, %491 : vector<8x32xf32>
    %494 = arith.divf %492, %493 : vector<8x32xf32>
    %495 = arith.mulf %486, %436 : vector<8x32xf32>
    %496 = arith.mulf %480, %488 : vector<8x32xf32>
    %497 = arith.addf %495, %496 : vector<8x32xf32>
    %498 = math.tanh %497 : vector<8x32xf32>
    %499 = arith.mulf %494, %498 : vector<8x32xf32>
    %c7 = arith.constant 7 : index
    %c0_115 = arith.constant 0 : index
    %c0_116 = arith.constant 0 : index
    %500 = vector.load %arg11[%c7, %c0_115, %c0_116] : memref<8x8x32xf32, #tpu.memory_space<vmem>>, vector<1x8x32xf32>
    %501 = vector.shape_cast %500 : vector<1x8x32xf32> to vector<8x32xf32>
    %502 = vector.shape_cast %499 : vector<8x32xf32> to vector<1x8x32xf32>
    tpu.vector_store %arg11[%c7, %c0_115, %c0_116], %502 {strides = array<i32>} : memref<8x8x32xf32, #tpu.memory_space<vmem>>, vector<1x8x32xf32>,
    %c0_117 = arith.constant 0 : index
    %c0_118 = arith.constant 0 : index
    %c0_119 = arith.constant 0 : index
    %503 = vector.load %arg11[%c0_117, %c0_118, %c0_119] : memref<8x8x32xf32, #tpu.memory_space<vmem>>, vector<8x8x32xf32>
    %c0_120 = arith.constant 0 : index
    %c0_121 = arith.constant 0 : index
    %c0_122 = arith.constant 0 : index
    %504 = vector.load %arg7[%c0_120, %c0_121, %c0_122] : memref<1x1x32xf32, #tpu.memory_space<vmem>>, vector<1x1x32xf32>
    %505 = vector.broadcast %504 : vector<1x1x32xf32> to vector<8x8x32xf32>
    %506 = arith.mulf %503, %505 : vector<8x8x32xf32>
    %cst_123 = arith.constant dense<0.000000e+00> : vector<8x8xf32>
    %507 = vector.multi_reduction <add>, %506, %cst_123 [2] : vector<8x8x32xf32> to vector<8x8xf32>
    %508 = tpu.transpose %507, [1, 0] : vector<8x8xf32> -> vector<8x8xf32>
    %c0_124 = arith.constant 0 : index
    %c0_125 = arith.constant 0 : index
    %509 = vector.load %arg8[%c0_124, %c0_125] : memref<1x1xf32, #tpu.memory_space<vmem>>, vector<1x1xf32>
    %510 = vector.broadcast %509 : vector<1x1xf32> to vector<8x8xf32>
    %511 = arith.addf %508, %510 : vector<8x8xf32>
    %c0_126 = arith.constant 0 : index
    %c0_127 = arith.constant 0 : index
    %512 = vector.load %arg9[%c0_126, %c0_127] : memref<8x8xf32, #tpu.memory_space<vmem>>, vector<8x8xf32>
    tpu.vector_store %arg9[%c0_126, %c0_127], %511 {strides = array<i32>} : memref<8x8xf32, #tpu.memory_space<vmem>>, vector<8x8xf32>,
    return
  }
}

</mosaic_0001>

<bundles_post_ra>
// kernel: _lstm_runoff_forward_impl.1
= control target key start
LH: loop header
LB: loop body
LE: loop exit
PB: predicated region body
PF: predicated region fallthrough
CT: control target
= control target key end

     0   :  { %vm85_vm0 = vcmask 1043456   ;;  %vm60_vm1 = vcmask 31744   ;;  %v1657_v6 = vmov 0.0   ;;  %s1658_s21 = smov 64   ;;  %s1659_s22 = smov 32   ;;  %vm139_vm6 = vcmask 261120   ;;  %s2115_s2 = inlined_call_operand.vmem [shape: f32[32,128], index: 2, kind: input, shape index: {}]   ;;  %s2116_s1 = inlined_call_operand.vmem [shape: f32[4,128], index: 1, kind: input, shape index: {}]   ;;  %s2117_s0 = inlined_call_operand.vmem [shape: f32[64,4], index: 0, kind: input, shape index: {}]   ;;  %s2118_s3 = inlined_call_operand.vmem [shape: f32[1,128], index: 3, kind: input, shape index: {}]   ;;  %s2119_s5 = inlined_call_operand.vmem [shape: f32[32,128], index: 5, kind: input, shape index: {}]   ;;  %s2120_s4 = inlined_call_operand.vmem [shape: f32[32,128], index: 4, kind: input, shape index: {}]   ;;  %s2121_s6 = inlined_call_operand.vmem [shape: f32[1,128], index: 6, kind: input, shape index: {}]   ;;  %s2122_s7 = inlined_call_operand.vmem [shape: f32[1,1,32], index: 7, kind: input, shape index: {}]   ;;  %s2123_s8 = inlined_call_operand.<no memory space> [shape: f32[1,1], index: 8, kind: input, shape index: {}]   ;;  %s2124_s9 = inlined_call_operand.vmem [shape: f32[8,8], index: 9, kind: output, shape index: {}]  }
   0x1   :  { %v1714_v0 = vld [vmem:[%s2115_s2 + $0x18] sm:$0xff]  ;;  %v1719_v1 = vld [vmem:[%s2115_s2 + $0x10] sm:$0xff]  ;;  %v55_v2 = vld [vmem:[%s2116_s1] sm:$0xf] }
   0x2   :  { %155 = vmatpush.msra.mxu1 %v1714_v0  ;;  %1465 = vmatpush.msk.msra.mxu0 %vm85_vm0, %v55_v2  ;;  %v47_v3 = vld [vmem:[%s2117_s0] sm:$0xff]  ;;  %v1731_v4 = vld [vmem:[%s2115_s2 + $0x8] sm:$0xff]  ;;  %v1766_v32 = vld [vmem:[%s2119_s5 + $0x18] sm:$0xff] }
   0x3   :  { %1466 = vmatmul.msk.f32.vlgmr.msra.gmra.mxu0 %vm60_vm1, %v47_v3  ;;  %v1738_v5 = vld [vmem:[%s2115_s2] sm:$0xff]  ;;  %v1771_v33 = vld [vmem:[%s2120_s4 + $0x18] sm:$0xff]  ;;  %v1776_v34 = vld [vmem:[%s2119_s5 + $0x10] sm:$0xff]  ;;  %213 = vmatpush.msra.mxu2 %v1766_v32 }
   0x4   :  { %156 = vmatpush.msra.mxu1 %v1719_v1  ;;  %v1754_v7 = vld [vmem:[%s2118_s3] ss:$0 sm:$0xff]  ;;  %238 = vmatpush.msra.mxu3 %v1771_v33  ;;  %v1783_v35 = vld [vmem:[%s2120_s4 + $0x10] sm:$0xff]  ;;  %v1788_v36 = vld [vmem:[%s2119_s5 + $0x8] sm:$0xff] }
   0x5   :  { %v1793_v37 = vld [vmem:[%s2120_s4 + $0x8] sm:$0xff]  ;;  %214 = vmatpush.msra.mxu2 %v1776_v34  ;;  %v1804_v39 = vld [vmem:[%s2119_s5] sm:$0xff] }
   0x6   :  { %157 = vmatpush.msra.mxu1 %v1731_v4  ;;  %v48_v38 = vld [vmem:[%s2117_s0 + $0x8] sm:$0xff]  ;;  %239 = vmatpush.msra.mxu3 %v1783_v35  ;;  %v1809_v40 = vld [vmem:[%s2120_s4] sm:$0xff] }
   0x7   :  { %215 = vmatpush.msra.mxu2 %v1788_v36  ;;  %v1842_v45 = vld [vmem:[%s2121_s6] ss:$0 sm:$0xff] }
   0x8   :  { %158 = vmatpush.msra.mxu1 %v1738_v5  ;;  %240 = vmatpush.msra.mxu3 %v1793_v37 }
   0x9   :  { %159 = vmatmul.f32.vlgmr.msra.gmra.mxu1 %v1657_v6  ;;  %216 = vmatpush.msra.mxu2 %v1804_v39 }
   0xa   :  { %305 = vmatpush.msrb.mxu1 %v1714_v0  ;;  %241 = vmatpush.msra.mxu3 %v1809_v40 }
   0xb   :  { %1467 = vmatmul.msk.f32.gmra.mxu0 %vm60_vm1, %v48_v38  ;;  %217 = vmatmul.f32.vlgmr.msra.gmra.mxu2 %v1657_v6 }
   0xc   :  { %306 = vmatpush.msrb.mxu1 %v1719_v1  ;;  %390 = vmatpush.msrb.mxu3 %v1771_v33 }
   0xd   :  { %365 = vmatpush.msrb.mxu2 %v1766_v32 }
   0xe   :  { %307 = vmatpush.msrb.mxu1 %v1731_v4  ;;  %391 = vmatpush.msrb.mxu3 %v1783_v35 }
   0xf   :  { %366 = vmatpush.msrb.mxu2 %v1776_v34 }
  0x10   :  { %308 = vmatpush.msrb.mxu1 %v1738_v5  ;;  %392 = vmatpush.msrb.mxu3 %v1793_v37 }
  0x11   :  { %367 = vmatpush.msrb.mxu2 %v1788_v36 }
  0x12   :  { %455 = vmatpush.msra.mxu1 %v1714_v0  ;;  %393 = vmatpush.msrb.mxu3 %v1809_v40 }
  0x13   :  { %368 = vmatpush.msrb.mxu2 %v1804_v39 }
  0x14   :  { %456 = vmatpush.msra.mxu1 %v1719_v1 }
  0x15   :  { %515 = vmatpush.msra.mxu2 %v1766_v32 }
  0x16   :  { %457 = vmatpush.msra.mxu1 %v1731_v4 }
  0x17   :  { %516 = vmatpush.msra.mxu2 %v1776_v34 }
  0x18   :  { %458 = vmatpush.msra.mxu1 %v1738_v5 }
  0x19   :  { %517 = vmatpush.msra.mxu2 %v1788_v36 }
  0x1b   :  { %518 = vmatpush.msra.mxu2 %v1804_v39 }
  0x80   :  { %v106_v8 = vpop.f32.mrf.mxu0 }
  0x81   :  { %v107_v9 = vadd.f32 %v1754_v7, %v106_v8 }
  0x86   :  { %v160_v10 = vpop.f32.mrf.mxu1 }
  0x87   :  { %v163_v11 = vadd.f32 %v160_v10, %v107_v9 }
  0x88   :  { %v109_v48 = vpop.f32.mrf.mxu0 }
  0x89   :  { %1521 = vtanh.f32 %v163_v11  ;;  %v1474_v13 = vmul.f32 -1.442695, %v163_v11  ;;  %v110_v50 = vadd.f32 %v1754_v7, %v109_v48 }
  0x8b   :  { %1523 = vpow2.f32 %v1474_v13 }
  0x8e   :  { %v218_v44 = vpop.f32.mrf.mxu2 }
  0x8f   :  { %v1522_v12 = vpop.eup %1521 }
  0x90   :  { %186 = vrot.lane.b32.xlu0 %v1522_v12, %s1658_s21 }
  0x91   :  { %v1524_v14 = vpop.eup %1523 }
  0x92   :  { %v167_v15 = vadd.f32 1.0, %v1524_v14 }
  0x94   :  { %1525 = vrcp.f32 %v167_v15  ;;  %v179_v21 = vand.u32 2147483648, %v167_v15  ;;  %vm173_vm3 = vweird.f32 %v167_v15  ;;  %v177_v22 = vand.u32 2147483647, %v167_v15 }
  0x96   :  { %v180_v24 = vor.u32 1.1754944e-38, %v179_v21  ;;  %vm178_vm5 = vcmp.eq.f32.partialorder %v177_v22, 8.507059e+37 }
  0x9a   :  { %v1526_v16 = vpop.eup %1525 }
  0x9b   :  { %v169_v17 = vmul.f32 %v1526_v16, %v167_v15  ;;  %vm174_vm2 = vweird.f32 %v1526_v16 }
  0x9c   :  { %vm175_vm4 = vmor %vm173_vm3, %vm174_vm2 }
  0x9d   :  { %v170_v18 = vsub.f32 1.0, %v169_v17 }
  0x9f   :  { %v171_v19 = vmul.f32 %v1526_v16, %v170_v18 }
  0xa1   :  { %v172_v20 = vadd.f32 %v1526_v16, %v171_v19 }
  0xa3   :  { %v176_v23 = vsel %vm175_vm4, %v1526_v16, %v172_v20 }
  0xa4   :  { %v181_v26 = vsel %vm178_vm5, %v180_v24, %v176_v23 }
  0xa5   :  { %v184_v28 = vmul.f32 0.0, %v181_v26 }
 0x102   :  { %v187_v25 = vpop.permute.xlu0 %186 }
 0x103   :  { %v189_v27 = vmul.f32 %v187_v25, %v181_v26 }
 0x105   :  { %191 = vrot.lane.b32.xlu0 %v189_v27, %s1659_s22 }
 0x177   :  { %v192_v29 = vpop.permute.xlu0 %191 }
 0x178   :  { %v1759_v30 = vadd.f32 %v192_v29, %v184_v28 }
 0x17a   :  { %1527 = vtanh.f32 %v1759_v30 }
 0x180   :  { %v1528_v31 = vpop.eup %1527 }
 0x181   :  { %197 = vrot.lane.b32.xlu1 %v1528_v31, %s1658_s21 }
 0x1f3   :  { %v198_v41 = vpop.permute.xlu1 %197 }
 0x1f4   :  { %v200_v42 = vmul.f32 %v198_v41, %v181_v26 }
 0x1f6   :  { %222 = vrot.lane.b32.xlu1 %v200_v42, %s1659_s22 }
 0x268   :  { %v223_v43 = vpop.permute.xlu1 %222 }
 0x269   :  { %1475 = vmatmul.msk.f32.vlgmr.msra.gmra.mxu3 %vm139_vm6, %v223_v43  ;;  %1477 = vmatmul.msk.f32.vlgmr.msrb.gmra.mxu1 %vm139_vm6, %v223_v43 }
 0x26a   :  { %605 = vmatpush.msrb.mxu1 %v1714_v0  ;;  %540 = vmatpush.msra.mxu3 %v1771_v33 }
 0x26c   :  { %606 = vmatpush.msrb.mxu1 %v1719_v1  ;;  %541 = vmatpush.msra.mxu3 %v1783_v35 }
 0x26e   :  { %607 = vmatpush.msrb.mxu1 %v1731_v4  ;;  %542 = vmatpush.msra.mxu3 %v1793_v37 }
 0x270   :  { %608 = vmatpush.msrb.mxu1 %v1738_v5  ;;  %543 = vmatpush.msra.mxu3 %v1809_v40 }
 0x2e6   :  { %v310_v51 = vpop.f32.mrf.mxu1 }
 0x2e7   :  { %v313_v52 = vadd.f32 %v310_v51, %v110_v50 }
 0x2e9   :  { %v1478_v56 = vmul.f32 -1.442695, %v313_v52 }
 0x2ec   :  { %v243_v46 = vpop.f32.mrf.mxu3 }
 0x2ed   :  { %v244_v47 = vadd.f32 %v243_v46, %v218_v44 }
 0x2ef   :  { %v249_v49 = vadd.f32 %v1842_v45, %v244_v47 }
 0x2f1   :  { %1529 = vtanh.f32 %v249_v49  ;;  %v1476_v55 = vmul.f32 -1.442695, %v249_v49 }
 0x2f2   :  { %1531 = vtanh.f32 %v313_v52 }
 0x2f3   :  { %1533 = vpow2.f32 %v1476_v55 }
 0x2f4   :  { %1535 = vpow2.f32 %v1478_v56 }
 0x2f7   :  { %v1530_v53 = vpop.eup %1529 }
 0x2f8   :  { %272 = vrot.lane.b32.xlu2 %v1530_v53, %s1658_s21  ;;  %v1532_v54 = vpop.eup %1531 }
 0x2f9   :  { %v1534_v57 = vpop.eup %1533 }
 0x2fa   :  { %v253_v58 = vadd.f32 1.0, %v1534_v57  ;;  %v1536_v59 = vpop.eup %1535 }
 0x2fb   :  { %v317_v60 = vadd.f32 1.0, %v1536_v59 }
 0x2fc   :  { %1537 = vrcp.f32 %v253_v58  ;;  %v265_v10 = vand.u32 2147483648, %v253_v58  ;;  %vm259_vm8 = vweird.f32 %v253_v58  ;;  %v263_v11 = vand.u32 2147483647, %v253_v58 }
 0x2fd   :  { %1539 = vrcp.f32 %v317_v60  ;;  %v329_v19 = vand.u32 2147483648, %v317_v60  ;;  %vm323_vm12 = vweird.f32 %v317_v60  ;;  %v327_v20 = vand.u32 2147483647, %v317_v60 }
 0x2fe   :  { %v266_v14 = vor.u32 1.1754944e-38, %v265_v10  ;;  %vm264_vm10 = vcmp.eq.f32.partialorder %v263_v11, 8.507059e+37 }
 0x2ff   :  { %v330_v22 = vor.u32 1.1754944e-38, %v329_v19  ;;  %vm328_vm14 = vcmp.eq.f32.partialorder %v327_v20, 8.507059e+37 }
 0x300   :  { %336 = vrot.lane.b32.xlu2 %v1532_v54, %s1658_s21 }
 0x302   :  { %v1538_v61 = vpop.eup %1537 }
 0x303   :  { %v255_v62 = vmul.f32 %v1538_v61, %v253_v58  ;;  %v1540_v2 = vpop.eup %1539  ;;  %vm260_vm7 = vweird.f32 %v1538_v61 }
 0x304   :  { %v319_v6 = vmul.f32 %v1540_v2, %v317_v60  ;;  %vm261_vm9 = vmor %vm259_vm8, %vm260_vm7  ;;  %vm324_vm11 = vweird.f32 %v1540_v2 }
 0x305   :  { %v256_v63 = vsub.f32 1.0, %v255_v62  ;;  %vm325_vm13 = vmor %vm323_vm12, %vm324_vm11 }
 0x306   :  { %v320_v9 = vsub.f32 1.0, %v319_v6 }
 0x307   :  { %v257_v3 = vmul.f32 %v1538_v61, %v256_v63 }
 0x308   :  { %v321_v13 = vmul.f32 %v1540_v2, %v320_v9 }
 0x309   :  { %v258_v8 = vadd.f32 %v1538_v61, %v257_v3 }
 0x30a   :  { %v322_v18 = vadd.f32 %v1540_v2, %v321_v13 }
 0x30b   :  { %v262_v12 = vsel %vm261_vm9, %v1538_v61, %v258_v8 }
 0x30c   :  { %v267_v16 = vsel %vm264_vm10, %v266_v14, %v262_v12  ;;  %v326_v21 = vsel %vm325_vm13, %v1540_v2, %v322_v18 }
 0x30d   :  { %v331_v23 = vsel %vm328_vm14, %v330_v22, %v326_v21  ;;  %v270_v26 = vmul.f32 0.0, %v267_v16 }
 0x30e   :  { %v334_v29 = vmul.f32 %v331_v23, %v1759_v30  ;;  %v49_v30 = vld [vmem:[%s2117_s0 + $0x10] sm:$0xff] }
 0x30f   :  { %1468 = vmatmul.msk.f32.gmra.mxu0 %vm60_vm1, %v49_v30 }
 0x352   :  { %v273_v15 = vpop.permute.xlu2 %272 }
 0x353   :  { %v275_v17 = vmul.f32 %v273_v15, %v267_v16 }
 0x355   :  { %277 = vrot.lane.b32.xlu0 %v275_v17, %s1659_s22 }
 0x35a   :  { %v337_v24 = vpop.permute.xlu2 %336 }
 0x35b   :  { %v339_v25 = vmul.f32 %v337_v24, %v331_v23 }
 0x35d   :  { %341 = vrot.lane.b32.xlu1 %v339_v25, %s1659_s22 }
 0x38c   :  { %v112_v50 = vpop.f32.mrf.mxu0 }
 0x38d   :  { %v113_v51 = vadd.f32 %v1754_v7, %v112_v50 }
 0x3c7   :  { %v278_v27 = vpop.permute.xlu0 %277 }
 0x3c8   :  { %v1850_v28 = vadd.f32 %v278_v27, %v270_v26 }
 0x3ca   :  { %1541 = vtanh.f32 %v1850_v28 }
 0x3cf   :  { %v342_v31 = vpop.permute.xlu1 %341 }
 0x3d0   :  { %v1542_v38 = vpop.eup %1541  ;;  %v1854_v41 = vadd.f32 %v342_v31, %v334_v29 }
 0x3d1   :  { %283 = vrot.lane.b32.xlu2 %v1542_v38, %s1658_s21 }
 0x3d2   :  { %1543 = vtanh.f32 %v1854_v41 }
 0x3d8   :  { %v1544_v42 = vpop.eup %1543 }
 0x3d9   :  { %347 = vrot.lane.b32.xlu0 %v1544_v42, %s1658_s21 }
 0x42b   :  { %v284_v43 = vpop.permute.xlu2 %283 }
 0x42c   :  { %v286_v44 = vmul.f32 %v284_v43, %v267_v16 }
 0x42e   :  { %288 = vrot.lane.b32.xlu1 %v286_v44, %s1659_s22 }
 0x44b   :  { %v348_v46 = vpop.permute.xlu0 %347 }
 0x44c   :  { %v350_v47 = vmul.f32 %v348_v46, %v331_v23 }
 0x44e   :  { %374 = vrot.lane.b32.xlu2 %v350_v47, %s1659_s22 }
 0x4a0   :  { %v289_v48 = vpop.permute.xlu1 %288 }
 0x4a1   :  { %291 = vst.msk [vmem:[#allocation3] sm:$0xff] %vm139_vm6, %v289_v48  ;;  %1479 = vmatmul.msk.f32.vlgmr.msrb.gmra.mxu2 %vm139_vm6, %v289_v48 }
 0x4a2   :  { %665 = vmatpush.msrb.mxu2 %v1766_v32 }
 0x4a4   :  { %666 = vmatpush.msrb.mxu2 %v1776_v34 }
 0x4a6   :  { %667 = vmatpush.msrb.mxu2 %v1788_v36 }
 0x4a8   :  { %v375_v49 = vpop.permute.xlu2 %374  ;;  %668 = vmatpush.msrb.mxu2 %v1804_v39 }
 0x4a9   :  { %1480 = vmatmul.msk.f32.vlgmr.msrb.gmra.mxu3 %vm139_vm6, %v375_v49  ;;  %1482 = vmatmul.msk.f32.vlgmr.msra.gmra.mxu1 %vm139_vm6, %v375_v49 }
 0x4aa   :  { %690 = vmatpush.msrb.mxu3 %v1771_v33  ;;  %755 = vmatpush.msra.mxu1 %v1714_v0 }
 0x4ac   :  { %691 = vmatpush.msrb.mxu3 %v1783_v35  ;;  %756 = vmatpush.msra.mxu1 %v1719_v1 }
 0x4ae   :  { %692 = vmatpush.msrb.mxu3 %v1793_v37  ;;  %757 = vmatpush.msra.mxu1 %v1731_v4 }
 0x4b0   :  { %693 = vmatpush.msrb.mxu3 %v1809_v40  ;;  %758 = vmatpush.msra.mxu1 %v1738_v5 }
 0x524   :  { %v370_v54 = vpop.f32.mrf.mxu2 }
 0x526   :  { %v460_v52 = vpop.f32.mrf.mxu1 }
 0x527   :  { %v463_v53 = vadd.f32 %v460_v52, %v113_v51 }
 0x529   :  { %1545 = vtanh.f32 %v463_v53  ;;  %v1483_v60 = vmul.f32 -1.442695, %v463_v53 }
 0x52c   :  { %v395_v55 = vpop.f32.mrf.mxu3 }
 0x52d   :  { %v396_v56 = vadd.f32 %v395_v55, %v370_v54 }
 0x52f   :  { %v1546_v57 = vpop.eup %1545  ;;  %v398_v58 = vadd.f32 %v1842_v45, %v396_v56 }
 0x530   :  { %486 = vrot.lane.b32.xlu1 %v1546_v57, %s1658_s21 }
 0x531   :  { %1547 = vtanh.f32 %v398_v58  ;;  %v1481_v61 = vmul.f32 -1.442695, %v398_v58 }
 0x532   :  { %1549 = vpow2.f32 %v1483_v60 }
 0x533   :  { %1551 = vpow2.f32 %v1481_v61 }
 0x537   :  { %v1548_v59 = vpop.eup %1547 }
 0x538   :  { %421 = vrot.lane.b32.xlu0 %v1548_v59, %s1658_s21  ;;  %v1550_v62 = vpop.eup %1549 }
 0x539   :  { %v467_v63 = vadd.f32 1.0, %v1550_v62  ;;  %v1552_v2 = vpop.eup %1551 }
 0x53a   :  { %v402_v3 = vadd.f32 1.0, %v1552_v2 }
 0x53b   :  { %1553 = vrcp.f32 %v467_v63  ;;  %v479_v15 = vand.u32 2147483648, %v467_v63  ;;  %vm473_vm0 = vweird.f32 %v467_v63  ;;  %v477_v16 = vand.u32 2147483647, %v467_v63 }
 0x53c   :  { %1555 = vrcp.f32 %v402_v3  ;;  %v414_v24 = vand.u32 2147483648, %v402_v3  ;;  %vm408_vm5 = vweird.f32 %v402_v3  ;;  %v412_v25 = vand.u32 2147483647, %v402_v3 }
 0x53d   :  { %v480_v19 = vor.u32 1.1754944e-38, %v479_v15  ;;  %vm478_vm3 = vcmp.eq.f32.partialorder %v477_v16, 8.507059e+37 }
 0x53e   :  { %v415_v27 = vor.u32 1.1754944e-38, %v414_v24  ;;  %vm413_vm8 = vcmp.eq.f32.partialorder %v412_v25, 8.507059e+37 }
 0x541   :  { %v1554_v6 = vpop.eup %1553 }
 0x542   :  { %v469_v8 = vmul.f32 %v1554_v6, %v467_v63  ;;  %v1556_v10 = vpop.eup %1555  ;;  %vm474_vm15 = vweird.f32 %v1554_v6 }
 0x543   :  { %v404_v12 = vmul.f32 %v1556_v10, %v402_v3  ;;  %vm475_vm2 = vmor %vm473_vm0, %vm474_vm15  ;;  %vm409_vm4 = vweird.f32 %v1556_v10 }
 0x544   :  { %v470_v9 = vsub.f32 1.0, %v469_v8  ;;  %vm410_vm7 = vmor %vm408_vm5, %vm409_vm4 }
 0x545   :  { %v405_v14 = vsub.f32 1.0, %v404_v12 }
 0x546   :  { %v471_v11 = vmul.f32 %v1554_v6, %v470_v9 }
 0x547   :  { %v406_v18 = vmul.f32 %v1556_v10, %v405_v14 }
 0x548   :  { %v472_v13 = vadd.f32 %v1554_v6, %v471_v11 }
 0x549   :  { %v407_v23 = vadd.f32 %v1556_v10, %v406_v18 }
 0x54a   :  { %v476_v17 = vsel %vm475_vm2, %v1554_v6, %v472_v13 }
 0x54b   :  { %v481_v21 = vsel %vm478_vm3, %v480_v19, %v476_v17  ;;  %v411_v26 = vsel %vm410_vm7, %v1556_v10, %v407_v23 }
 0x54c   :  { %v416_v31 = vsel %vm413_vm8, %v415_v27, %v411_v26  ;;  %v484_v47 = vmul.f32 %v481_v21, %v1854_v41 }
 0x54d   :  { %v419_v42 = vmul.f32 %v416_v31, %v1850_v28  ;;  %v50_v28 = vld [vmem:[%s2117_s0 + $0x18] sm:$0xff] }
 0x54e   :  { %1469 = vmatmul.msk.f32.gmra.mxu0 %vm60_vm1, %v50_v28 }
 0x5a2   :  { %v487_v20 = vpop.permute.xlu1 %486 }
 0x5a3   :  { %v489_v22 = vmul.f32 %v487_v20, %v481_v21 }
 0x5a5   :  { %491 = vrot.lane.b32.xlu0 %v489_v22, %s1659_s22 }
 0x5aa   :  { %v422_v29 = vpop.permute.xlu0 %421 }
 0x5ab   :  { %v424_v38 = vmul.f32 %v422_v29, %v416_v31 }
 0x5ad   :  { %426 = vrot.lane.b32.xlu2 %v424_v38, %s1659_s22 }
 0x5cb   :  { %v115_v55 = vpop.f32.mrf.mxu0 }
 0x5cc   :  { %v116_v56 = vadd.f32 %v1754_v7, %v115_v55 }
 0x607   :  { %v427_v43 = vpop.permute.xlu2 %426 }
 0x608   :  { %v1888_v44 = vadd.f32 %v427_v43, %v419_v42 }
 0x60a   :  { %1557 = vtanh.f32 %v1888_v44 }
 0x610   :  { %v1558_v46 = vpop.eup %1557 }
 0x611   :  { %432 = vrot.lane.b32.xlu1 %v1558_v46, %s1658_s21 }
 0x617   :  { %v492_v30 = vpop.permute.xlu0 %491 }
 0x618   :  { %v1893_v48 = vadd.f32 %v492_v30, %v484_v47 }
 0x61a   :  { %1559 = vtanh.f32 %v1893_v48 }
 0x620   :  { %v1560_v49 = vpop.eup %1559 }
 0x621   :  { %497 = vrot.lane.b32.xlu2 %v1560_v49, %s1658_s21 }
 0x67b   :  { %v498_v50 = vpop.permute.xlu2 %497 }
 0x67c   :  { %v500_v51 = vmul.f32 %v498_v50, %v481_v21 }
 0x67e   :  { %524 = vrot.lane.b32.xlu1 %v500_v51, %s1659_s22 }
 0x683   :  { %v433_v52 = vpop.permute.xlu1 %432 }
 0x684   :  { %v435_v41 = vmul.f32 %v433_v52, %v416_v31 }
 0x686   :  { %437 = vrot.lane.b32.xlu0 %v435_v41, %s1659_s22 }
 0x6f0   :  { %v525_v53 = vpop.permute.xlu1 %524 }
 0x6f1   :  { %1485 = vmatmul.msk.f32.vlgmr.msra.gmra.mxu3 %vm139_vm6, %v525_v53  ;;  %1487 = vmatmul.msk.f32.vlgmr.msrb.gmra.mxu1 %vm139_vm6, %v525_v53 }
 0x6f2   :  { %840 = vmatpush.msra.mxu3 %v1771_v33  ;;  %905 = vmatpush.msrb.mxu1 %v1714_v0 }
 0x6f4   :  { %841 = vmatpush.msra.mxu3 %v1783_v35  ;;  %906 = vmatpush.msrb.mxu1 %v1719_v1 }
 0x6f6   :  { %842 = vmatpush.msra.mxu3 %v1793_v37  ;;  %907 = vmatpush.msrb.mxu1 %v1731_v4 }
 0x6f8   :  { %v438_v54 = vpop.permute.xlu0 %437  ;;  %843 = vmatpush.msra.mxu3 %v1809_v40  ;;  %908 = vmatpush.msrb.mxu1 %v1738_v5 }
 0x6f9   :  { %441 = vst.msk [vmem:[#allocation3 + $0x8] sm:$0xff] %vm139_vm6, %v438_v54  ;;  %1484 = vmatmul.msk.f32.vlgmr.msra.gmra.mxu2 %vm139_vm6, %v438_v54 }
 0x6fa   :  { %815 = vmatpush.msra.mxu2 %v1766_v32 }
 0x6fc   :  { %816 = vmatpush.msra.mxu2 %v1776_v34 }
 0x6fe   :  { %817 = vmatpush.msra.mxu2 %v1788_v36 }
 0x700   :  { %818 = vmatpush.msra.mxu2 %v1804_v39 }
 0x76e   :  { %v610_v57 = vpop.f32.mrf.mxu1 }
 0x76f   :  { %v613_v58 = vadd.f32 %v610_v57, %v116_v56 }
 0x771   :  { %1561 = vtanh.f32 %v613_v58  ;;  %v1488_v6 = vmul.f32 -1.442695, %v613_v58 }
 0x774   :  { %v545_v60 = vpop.f32.mrf.mxu3 }
 0x777   :  { %v1562_v59 = vpop.eup %1561 }
 0x778   :  { %636 = vrot.lane.b32.xlu0 %v1562_v59, %s1658_s21 }
 0x77c   :  { %v520_v61 = vpop.f32.mrf.mxu2 }
 0x77d   :  { %v546_v62 = vadd.f32 %v545_v60, %v520_v61 }
 0x77f   :  { %v548_v63 = vadd.f32 %v1842_v45, %v546_v62 }
 0x781   :  { %1563 = vtanh.f32 %v548_v63  ;;  %v1486_v3 = vmul.f32 -1.442695, %v548_v63 }
 0x783   :  { %1565 = vpow2.f32 %v1486_v3 }
 0x784   :  { %1567 = vpow2.f32 %v1488_v6 }
 0x787   :  { %v1564_v2 = vpop.eup %1563 }
 0x788   :  { %571 = vrot.lane.b32.xlu2 %v1564_v2, %s1658_s21 }
 0x789   :  { %v1566_v8 = vpop.eup %1565 }
 0x78a   :  { %v552_v9 = vadd.f32 1.0, %v1566_v8  ;;  %v1568_v10 = vpop.eup %1567 }
 0x78b   :  { %v617_v11 = vadd.f32 1.0, %v1568_v10 }
 0x78c   :  { %1569 = vrcp.f32 %v552_v9  ;;  %v564_v20 = vand.u32 2147483648, %v552_v9  ;;  %vm558_vm10 = vweird.f32 %v552_v9  ;;  %v562_v21 = vand.u32 2147483647, %v552_v9 }
 0x78d   :  { %1571 = vrcp.f32 %v617_v11  ;;  %v629_v31 = vand.u32 2147483648, %v617_v11  ;;  %vm623_vm14 = vweird.f32 %v617_v11  ;;  %v627_v38 = vand.u32 2147483647, %v617_v11 }
 0x78e   :  { %v565_v24 = vor.u32 1.1754944e-38, %v564_v20  ;;  %vm563_vm12 = vcmp.eq.f32.partialorder %v562_v21, 8.507059e+37 }
 0x78f   :  { %v630_v43 = vor.u32 1.1754944e-38, %v629_v31  ;;  %vm628_vm0 = vcmp.eq.f32.partialorder %v627_v38, 8.507059e+37 }
 0x792   :  { %v1570_v12 = vpop.eup %1569 }
 0x793   :  { %v554_v13 = vmul.f32 %v1570_v12, %v552_v9  ;;  %v1572_v15 = vpop.eup %1571  ;;  %vm559_vm9 = vweird.f32 %v1570_v12 }
 0x794   :  { %v619_v17 = vmul.f32 %v1572_v15, %v617_v11  ;;  %vm560_vm11 = vmor %vm558_vm10, %vm559_vm9  ;;  %vm624_vm13 = vweird.f32 %v1572_v15 }
 0x795   :  { %v555_v14 = vsub.f32 1.0, %v554_v13  ;;  %vm625_vm15 = vmor %vm623_vm14, %vm624_vm13 }
 0x796   :  { %v620_v19 = vsub.f32 1.0, %v619_v17 }
 0x797   :  { %v556_v16 = vmul.f32 %v1570_v12, %v555_v14 }
 0x798   :  { %v621_v23 = vmul.f32 %v1572_v15, %v620_v19 }
 0x799   :  { %v557_v18 = vadd.f32 %v1570_v12, %v556_v16 }
 0x79a   :  { %v622_v29 = vadd.f32 %v1572_v15, %v621_v23 }
 0x79b   :  { %v561_v22 = vsel %vm560_vm11, %v1570_v12, %v557_v18 }
 0x79c   :  { %v566_v26 = vsel %vm563_vm12, %v565_v24, %v561_v22  ;;  %v626_v42 = vsel %vm625_vm15, %v1572_v15, %v622_v29 }
 0x79d   :  { %v631_v47 = vsel %vm628_vm0, %v630_v43, %v626_v42  ;;  %v569_v52 = vmul.f32 %v566_v26, %v1888_v44  ;;  %v51_v44 = vld [vmem:[%s2117_s0 + $0x20] sm:$0xff] }
 0x79e   :  { %v634_v49 = vmul.f32 %v631_v47, %v1893_v48  ;;  %1470 = vmatmul.msk.f32.gmra.mxu0 %vm60_vm1, %v51_v44 }
 0x7e2   :  { %v572_v25 = vpop.permute.xlu2 %571 }
 0x7e3   :  { %v574_v27 = vmul.f32 %v572_v25, %v566_v26 }
 0x7e5   :  { %576 = vrot.lane.b32.xlu1 %v574_v27, %s1659_s22 }
 0x7ea   :  { %v637_v46 = vpop.permute.xlu0 %636 }
 0x7eb   :  { %v639_v30 = vmul.f32 %v637_v46, %v631_v47 }
 0x7ed   :  { %641 = vrot.lane.b32.xlu2 %v639_v30, %s1659_s22 }
 0x81b   :  { %v118_v60 = vpop.f32.mrf.mxu0 }
 0x81c   :  { %v119_v61 = vadd.f32 %v1754_v7, %v118_v60 }
 0x847   :  { %v642_v28 = vpop.permute.xlu2 %641 }
 0x848   :  { %v1926_v50 = vadd.f32 %v642_v28, %v634_v49 }
 0x84a   :  { %1573 = vtanh.f32 %v1926_v50 }
 0x850   :  { %v1574_v51 = vpop.eup %1573 }
 0x851   :  { %647 = vrot.lane.b32.xlu1 %v1574_v51, %s1658_s21 }
 0x857   :  { %v577_v41 = vpop.permute.xlu1 %576 }
 0x858   :  { %v1931_v53 = vadd.f32 %v577_v41, %v569_v52 }
 0x85a   :  { %1575 = vtanh.f32 %v1931_v53 }
 0x860   :  { %v1576_v54 = vpop.eup %1575 }
 0x861   :  { %582 = vrot.lane.b32.xlu0 %v1576_v54, %s1658_s21 }
 0x8c3   :  { %v648_v55 = vpop.permute.xlu1 %647 }
 0x8c4   :  { %v650_v48 = vmul.f32 %v648_v55, %v631_v47 }
 0x8c6   :  { %674 = vrot.lane.b32.xlu0 %v650_v48, %s1659_s22 }
 0x8d3   :  { %v583_v56 = vpop.permute.xlu0 %582 }
 0x8d4   :  { %v585_v57 = vmul.f32 %v583_v56, %v566_v26 }
 0x8d6   :  { %587 = vrot.lane.b32.xlu2 %v585_v57, %s1659_s22 }
 0x930   :  { %v588_v58 = vpop.permute.xlu2 %587 }
 0x931   :  { %591 = vst.msk [vmem:[#allocation3 + $0x10] sm:$0xff] %vm139_vm6, %v588_v58  ;;  %1489 = vmatmul.msk.f32.vlgmr.msrb.gmra.mxu2 %vm139_vm6, %v588_v58 }
 0x932   :  { %965 = vmatpush.msrb.mxu2 %v1766_v32 }
 0x934   :  { %966 = vmatpush.msrb.mxu2 %v1776_v34 }
 0x936   :  { %967 = vmatpush.msrb.mxu2 %v1788_v36 }
 0x938   :  { %v675_v59 = vpop.permute.xlu0 %674  ;;  %968 = vmatpush.msrb.mxu2 %v1804_v39 }
 0x939   :  { %1490 = vmatmul.msk.f32.vlgmr.msrb.gmra.mxu3 %vm139_vm6, %v675_v59  ;;  %1492 = vmatmul.msk.f32.vlgmr.msra.gmra.mxu1 %vm139_vm6, %v675_v59 }
 0x93a   :  { %990 = vmatpush.msrb.mxu3 %v1771_v33  ;;  %1055 = vmatpush.msra.mxu1 %v1714_v0 }
 0x93c   :  { %991 = vmatpush.msrb.mxu3 %v1783_v35  ;;  %1056 = vmatpush.msra.mxu1 %v1719_v1 }
 0x93e   :  { %992 = vmatpush.msrb.mxu3 %v1793_v37  ;;  %1057 = vmatpush.msra.mxu1 %v1731_v4 }
 0x940   :  { %993 = vmatpush.msrb.mxu3 %v1809_v40  ;;  %1058 = vmatpush.msra.mxu1 %v1738_v5 }
 0x9b4   :  { %v670_v2 = vpop.f32.mrf.mxu2 }
 0x9b6   :  { %v760_v62 = vpop.f32.mrf.mxu1 }
 0x9b7   :  { %v763_v63 = vadd.f32 %v760_v62, %v119_v61 }
 0x9b9   :  { %1577 = vtanh.f32 %v763_v63  ;;  %v1493_v11 = vmul.f32 -1.442695, %v763_v63 }
 0x9bc   :  { %v695_v3 = vpop.f32.mrf.mxu3 }
 0x9bd   :  { %v696_v6 = vadd.f32 %v695_v3, %v670_v2 }
 0x9bf   :  { %v1578_v8 = vpop.eup %1577  ;;  %v698_v9 = vadd.f32 %v1842_v45, %v696_v6 }
 0x9c0   :  { %786 = vrot.lane.b32.xlu2 %v1578_v8, %s1658_s21 }
 0x9c1   :  { %1579 = vtanh.f32 %v698_v9  ;;  %v1491_v17 = vmul.f32 -1.442695, %v698_v9 }
 0x9c2   :  { %1581 = vpow2.f32 %v1493_v11 }
 0x9c7   :  { %v1580_v10 = vpop.eup %1579 }
 0x9c8   :  { %721 = vrot.lane.b32.xlu1 %v1580_v10, %s1658_s21  ;;  %v1582_v12 = vpop.eup %1581 }
 0x9c9   :  { %v767_v13 = vadd.f32 1.0, %v1582_v12 }
 0x9cb   :  { %1583 = vrcp.f32 %v767_v13  ;;  %v779_v20 = vand.u32 2147483648, %v767_v13  ;;  %vm773_vm3 = vweird.f32 %v767_v13  ;;  %v777_v21 = vand.u32 2147483647, %v767_v13 }
 0x9cc   :  { %1585 = vpow2.f32 %v1491_v17 }
 0x9cd   :  { %v780_v24 = vor.u32 1.1754944e-38, %v779_v20  ;;  %vm778_vm5 = vcmp.eq.f32.partialorder %v777_v21, 8.507059e+37 }
 0x9d1   :  { %v1584_v14 = vpop.eup %1583 }
 0x9d2   :  { %v769_v15 = vmul.f32 %v1584_v14, %v767_v13  ;;  %vm774_vm2 = vweird.f32 %v1584_v14  ;;  %v1586_v22 = vpop.eup %1585 }
 0x9d3   :  { %vm775_vm4 = vmor %vm773_vm3, %vm774_vm2  ;;  %v702_v25 = vadd.f32 1.0, %v1586_v22 }
 0x9d4   :  { %v770_v16 = vsub.f32 1.0, %v769_v15 }
 0x9d5   :  { %1587 = vrcp.f32 %v702_v25  ;;  %v714_v47 = vand.u32 2147483648, %v702_v25  ;;  %vm708_vm8 = vweird.f32 %v702_v25  ;;  %v712_v30 = vand.u32 2147483647, %v702_v25 }
 0x9d6   :  { %v771_v18 = vmul.f32 %v1584_v14, %v770_v16 }
 0x9d7   :  { %v715_v28 = vor.u32 1.1754944e-38, %v714_v47  ;;  %vm713_vm10 = vcmp.eq.f32.partialorder %v712_v30, 8.507059e+37 }
 0x9d8   :  { %v772_v19 = vadd.f32 %v1584_v14, %v771_v18 }
 0x9da   :  { %v776_v23 = vsel %vm775_vm4, %v1584_v14, %v772_v19 }
 0x9db   :  { %v781_v27 = vsel %vm778_vm5, %v780_v24, %v776_v23  ;;  %v1588_v31 = vpop.eup %1587 }
 0x9dc   :  { %v704_v38 = vmul.f32 %v1588_v31, %v702_v25  ;;  %vm709_vm7 = vweird.f32 %v1588_v31  ;;  %v784_v54 = vmul.f32 %v781_v27, %v1926_v50  ;;  %v52_v50 = vld [vmem:[%s2117_s0 + $0x28] sm:$0xff] }
 0x9dd   :  { %vm710_vm9 = vmor %vm708_vm8, %vm709_vm7  ;;  %1471 = vmatmul.msk.f32.gmra.mxu0 %vm60_vm1, %v52_v50  ;;  %v1649_v50 = vld [vmem:[%s2120_s4 + $0x18] sm:$0xff] }
 0x9de   :  { %v705_v42 = vsub.f32 1.0, %v704_v38 }
 0x9e0   :  { %v706_v43 = vmul.f32 %v1588_v31, %v705_v42 }
 0x9e2   :  { %v707_v46 = vadd.f32 %v1588_v31, %v706_v43 }
 0x9e4   :  { %v711_v49 = vsel %vm710_vm9, %v1588_v31, %v707_v46 }
 0x9e5   :  { %v716_v52 = vsel %vm713_vm10, %v715_v28, %v711_v49 }
 0x9e6   :  { %v719_v57 = vmul.f32 %v716_v52, %v1931_v53 }
 0xa1a   :  { %v787_v26 = vpop.permute.xlu2 %786 }
 0xa1b   :  { %v789_v29 = vmul.f32 %v787_v26, %v781_v27 }
 0xa1d   :  { %791 = vrot.lane.b32.xlu1 %v789_v29, %s1659_s22 }
 0xa3a   :  { %v722_v51 = vpop.permute.xlu1 %721 }
 0xa3b   :  { %v724_v41 = vmul.f32 %v722_v51, %v716_v52 }
 0xa3d   :  { %726 = vrot.lane.b32.xlu0 %v724_v41, %s1659_s22 }
 0xa8f   :  { %v792_v55 = vpop.permute.xlu1 %791 }
 0xa90   :  { %v1964_v48 = vadd.f32 %v792_v55, %v784_v54 }
 0xa92   :  { %1589 = vtanh.f32 %v1964_v48 }
 0xa98   :  { %v1590_v56 = vpop.eup %1589 }
 0xa99   :  { %797 = vrot.lane.b32.xlu0 %v1590_v56, %s1658_s21 }
 0xaaf   :  { %v727_v44 = vpop.permute.xlu0 %726 }
 0xab0   :  { %v1969_v58 = vadd.f32 %v727_v44, %v719_v57  ;;  %v53_v57 = vld [vmem:[%s2117_s0 + $0x30] sm:$0xff] }
 0xab1   :  { %1472 = vmatmul.msk.f32.gmra.mxu0 %vm60_vm1, %v53_v57 }
 0xab2   :  { %1591 = vtanh.f32 %v1969_v58 }
 0xab8   :  { %v1592_v59 = vpop.eup %1591 }
 0xab9   :  { %732 = vrot.lane.b32.xlu2 %v1592_v59, %s1658_s21 }
 0xb0b   :  { %v798_v60 = vpop.permute.xlu0 %797 }
 0xb0c   :  { %v800_v61 = vmul.f32 %v798_v60, %v781_v27  ;;  %v1650_v60 = vld [vmem:[%s2120_s4 + $0x10] sm:$0xff] }
 0xb0e   :  { %824 = vrot.lane.b32.xlu2 %v800_v61, %s1659_s22 }
 0xb13   :  { %v733_v62 = vpop.permute.xlu2 %732 }
 0xb14   :  { %v735_v53 = vmul.f32 %v733_v62, %v716_v52  ;;  %v1651_v62 = vld [vmem:[%s2119_s5 + $0x18] sm:$0xff] }
 0xb16   :  { %737 = vrot.lane.b32.xlu1 %v735_v53, %s1659_s22  ;;  %v1652_v53 = vld [vmem:[%s2119_s5 + $0x10] sm:$0xff] }
 0xb68   :  { %v825_v63 = vpop.permute.xlu2 %824 }
 0xb69   :  { %1495 = vmatmul.msk.f32.vlgmr.msra.gmra.mxu3 %vm139_vm6, %v825_v63  ;;  %1497 = vmatmul.msk.f32.vlgmr.msrb.gmra.mxu1 %vm139_vm6, %v825_v63 }
 0xb6a   :  { %1140 = vmatpush.msra.mxu3 %v1771_v33  ;;  %1205 = vmatpush.msrb.mxu1 %v1714_v0  ;;  %v121_v0 = vpop.f32.mrf.mxu0 }
 0xb6c   :  { %1141 = vmatpush.msra.mxu3 %v1783_v35  ;;  %1206 = vmatpush.msrb.mxu1 %v1719_v1  ;;  %v122_v1 = vadd.f32 %v1754_v7, %v121_v0 }
 0xb6e   :  { %1142 = vmatpush.msra.mxu3 %v1793_v37  ;;  %1207 = vmatpush.msrb.mxu1 %v1731_v4 }
 0xb70   :  { %1143 = vmatpush.msra.mxu3 %v1809_v40  ;;  %1208 = vmatpush.msrb.mxu1 %v1738_v5 }
 0xb72   :  { %v124_v63 = vpop.f32.mrf.mxu0 }
 0xb88   :  { %v738_v2 = vpop.permute.xlu1 %737 }
 0xb89   :  { %741 = vst.msk [vmem:[#allocation3 + $0x18] sm:$0xff] %vm139_vm6, %v738_v2  ;;  %1494 = vmatmul.msk.f32.vlgmr.msra.gmra.mxu2 %vm139_vm6, %v738_v2  ;;  %v2044_v2 = vld [vmem:[%s2118_s3] ss:$0 sm:$0xff] }
 0xb8a   :  { %1115 = vmatpush.msra.mxu2 %v1766_v32  ;;  %v125_v0 = vadd.f32 %v2044_v2, %v124_v63  ;;  %v2077_v63 = vld [vmem:[%s2121_s6] ss:$0 sm:$0xff] }
 0xb8c   :  { %1116 = vmatpush.msra.mxu2 %v1776_v34 }
 0xb8e   :  { %1117 = vmatpush.msra.mxu2 %v1788_v36 }
 0xb90   :  { %1118 = vmatpush.msra.mxu2 %v1804_v39 }
 0xbe6   :  { %v910_v4 = vpop.f32.mrf.mxu1 }
 0xbe7   :  { %v913_v33 = vadd.f32 %v910_v4, %v122_v1 }
 0xbe9   :  { %1593 = vtanh.f32 %v913_v33  ;;  %v1498_v36 = vmul.f32 -1.442695, %v913_v33 }
 0xbec   :  { %v845_v35 = vpop.f32.mrf.mxu3 }
 0xbef   :  { %v1594_v5 = vpop.eup %1593 }
 0xbf0   :  { %936 = vrot.lane.b32.xlu1 %v1594_v5, %s1658_s21 }
 0xc0c   :  { %v820_v3 = vpop.f32.mrf.mxu2 }
 0xc0d   :  { %v846_v6 = vadd.f32 %v845_v35, %v820_v3 }
 0xc0f   :  { %v848_v32 = vadd.f32 %v1842_v45, %v846_v6 }
 0xc11   :  { %1595 = vtanh.f32 %v848_v32  ;;  %v1496_v14 = vmul.f32 -1.442695, %v848_v32 }
 0xc12   :  { %1597 = vpow2.f32 %v1498_v36 }
 0xc17   :  { %v1596_v34 = vpop.eup %1595 }
 0xc18   :  { %871 = vrot.lane.b32.xlu0 %v1596_v34, %s1658_s21  ;;  %v1598_v39 = vpop.eup %1597 }
 0xc19   :  { %v917_v8 = vadd.f32 1.0, %v1598_v39 }
 0xc1b   :  { %1599 = vrcp.f32 %v917_v8  ;;  %v929_v13 = vand.u32 2147483648, %v917_v8  ;;  %vm923_vm12 = vweird.f32 %v917_v8  ;;  %v927_v15 = vand.u32 2147483647, %v917_v8 }
 0xc1c   :  { %1601 = vpow2.f32 %v1496_v14 }
 0xc1d   :  { %v930_v17 = vor.u32 1.1754944e-38, %v929_v13  ;;  %vm928_vm14 = vcmp.eq.f32.partialorder %v927_v15, 8.507059e+37 }
 0xc21   :  { %v1600_v7 = vpop.eup %1599 }
 0xc22   :  { %v919_v9 = vmul.f32 %v1600_v7, %v917_v8  ;;  %vm924_vm11 = vweird.f32 %v1600_v7  ;;  %v1602_v21 = vpop.eup %1601 }
 0xc23   :  { %vm925_vm13 = vmor %vm923_vm12, %vm924_vm11  ;;  %v852_v22 = vadd.f32 1.0, %v1602_v21 }
 0xc24   :  { %v920_v10 = vsub.f32 1.0, %v919_v9 }
 0xc25   :  { %1603 = vrcp.f32 %v852_v22  ;;  %v864_v29 = vand.u32 2147483648, %v852_v22  ;;  %vm858_vm0 = vweird.f32 %v852_v22  ;;  %v862_v31 = vand.u32 2147483647, %v852_v22 }
 0xc26   :  { %v921_v11 = vmul.f32 %v1600_v7, %v920_v10 }
 0xc27   :  { %v865_v42 = vor.u32 1.1754944e-38, %v864_v29  ;;  %vm863_vm3 = vcmp.eq.f32.partialorder %v862_v31, 8.507059e+37 }
 0xc28   :  { %v922_v12 = vadd.f32 %v1600_v7, %v921_v11 }
 0xc2a   :  { %v926_v16 = vsel %vm925_vm13, %v1600_v7, %v922_v12 }
 0xc2b   :  { %v931_v19 = vsel %vm928_vm14, %v930_v17, %v926_v16  ;;  %v1604_v23 = vpop.eup %1603 }
 0xc2c   :  { %v854_v24 = vmul.f32 %v1604_v23, %v852_v22  ;;  %vm859_vm15 = vweird.f32 %v1604_v23  ;;  %v934_v30 = vmul.f32 %v931_v19, %v1964_v48 }
 0xc2d   :  { %vm860_vm2 = vmor %vm858_vm0, %vm859_vm15 }
 0xc2e   :  { %v855_v25 = vsub.f32 1.0, %v854_v24 }
 0xc30   :  { %v856_v26 = vmul.f32 %v1604_v23, %v855_v25 }
 0xc32   :  { %v857_v27 = vadd.f32 %v1604_v23, %v856_v26 }
 0xc34   :  { %v861_v38 = vsel %vm860_vm2, %v1604_v23, %v857_v27 }
 0xc35   :  { %v866_v46 = vsel %vm863_vm3, %v865_v42, %v861_v38 }
 0xc36   :  { %v869_v52 = vmul.f32 %v866_v46, %v1969_v58 }
 0xc62   :  { %v937_v18 = vpop.permute.xlu1 %936 }
 0xc63   :  { %v939_v20 = vmul.f32 %v937_v18, %v931_v19 }
 0xc65   :  { %941 = vrot.lane.b32.xlu0 %v939_v20, %s1659_s22 }
 0xc8a   :  { %v872_v43 = vpop.permute.xlu0 %871 }
 0xc8b   :  { %v874_v47 = vmul.f32 %v872_v43, %v866_v46 }
 0xc8d   :  { %876 = vrot.lane.b32.xlu2 %v874_v47, %s1659_s22 }
 0xcd7   :  { %v942_v49 = vpop.permute.xlu0 %941 }
 0xcd8   :  { %v2002_v28 = vadd.f32 %v942_v49, %v934_v30 }
 0xcda   :  { %1605 = vtanh.f32 %v2002_v28 }
 0xce0   :  { %v1606_v51 = vpop.eup %1605 }
 0xce1   :  { %947 = vrot.lane.b32.xlu2 %v1606_v51, %s1658_s21 }
 0xce7   :  { %v877_v41 = vpop.permute.xlu2 %876 }
 0xce8   :  { %v2007_v54 = vadd.f32 %v877_v41, %v869_v52 }
 0xcea   :  { %1607 = vtanh.f32 %v2007_v54 }
 0xcf0   :  { %v1608_v55 = vpop.eup %1607 }
 0xcf1   :  { %882 = vrot.lane.b32.xlu1 %v1608_v55, %s1658_s21 }
 0xd3b   :  { %v948_v56 = vpop.permute.xlu2 %947 }
 0xd3c   :  { %v950_v48 = vmul.f32 %v948_v56, %v931_v19 }
 0xd3e   :  { %974 = vrot.lane.b32.xlu1 %v950_v48, %s1659_s22  ;;  %v54_v48 = vld [vmem:[%s2117_s0 + $0x38] sm:$0xff] }
 0xd3f   :  { %1473 = vmatmul.msk.f32.gmra.mxu0 %vm60_vm1, %v54_v48 }
 0xd63   :  { %v883_v44 = vpop.permute.xlu1 %882 }
 0xd64   :  { %v885_v58 = vmul.f32 %v883_v44, %v866_v46 }
 0xd66   :  { %887 = vrot.lane.b32.xlu0 %v885_v58, %s1659_s22 }
 0xdb0   :  { %v975_v59 = vpop.permute.xlu1 %974 }
 0xdb1   :  { %1500 = vmatmul.msk.f32.vlgmr.msrb.gmra.mxu3 %vm139_vm6, %v975_v59  ;;  %1502 = vmatmul.msk.f32.vlgmr.msra.gmra.mxu1 %vm139_vm6, %v975_v59 }
 0xdb2   :  { %1290 = vmatpush.msrb.mxu3 %v1649_v50 }
 0xdb4   :  { %1291 = vmatpush.msrb.mxu3 %v1650_v60 }
 0xdb6   :  { %1292 = vmatpush.msrb.mxu3 %v1793_v37  ;;  %v1653_v37 = vld [vmem:[%s2119_s5 + $0x8] sm:$0xff] }
 0xdb8   :  { %1293 = vmatpush.msrb.mxu3 %v1809_v40  ;;  %v1654_v40 = vld [vmem:[%s2119_s5] sm:$0xff] }
 0xdbc   :  { %v127_v59 = vpop.f32.mrf.mxu0 }
 0xdbd   :  { %v128_v50 = vadd.f32 %v2044_v2, %v127_v59 }
 0xdd8   :  { %v888_v61 = vpop.permute.xlu0 %887 }
 0xdd9   :  { %891 = vst.msk [vmem:[#allocation3 + $0x20] sm:$0xff] %vm139_vm6, %v888_v61  ;;  %1499 = vmatmul.msk.f32.vlgmr.msrb.gmra.mxu2 %vm139_vm6, %v888_v61 }
 0xdda   :  { %1265 = vmatpush.msrb.mxu2 %v1651_v62 }
 0xddc   :  { %1266 = vmatpush.msrb.mxu2 %v1652_v53 }
 0xdde   :  { %1267 = vmatpush.msrb.mxu2 %v1653_v37 }
 0xde0   :  { %1268 = vmatpush.msrb.mxu2 %v1654_v40 }
 0xe2e   :  { %v1060_v1 = vpop.f32.mrf.mxu1 }
 0xe2f   :  { %v1063_v4 = vadd.f32 %v1060_v1, %v125_v0 }
 0xe31   :  { %1609 = vtanh.f32 %v1063_v4  ;;  %v1503_v34 = vmul.f32 -1.442695, %v1063_v4 }
 0xe34   :  { %v995_v5 = vpop.f32.mrf.mxu3 }
 0xe37   :  { %v1610_v33 = vpop.eup %1609 }
 0xe38   :  { %1086 = vrot.lane.b32.xlu0 %v1610_v33, %s1658_s21 }
 0xe5c   :  { %v970_v35 = vpop.f32.mrf.mxu2 }
 0xe5d   :  { %v996_v3 = vadd.f32 %v995_v5, %v970_v35 }
 0xe5f   :  { %v998_v6 = vadd.f32 %v1842_v45, %v996_v3 }
 0xe61   :  { %1611 = vtanh.f32 %v998_v6  ;;  %v1501_v7 = vmul.f32 -1.442695, %v998_v6 }
 0xe62   :  { %1613 = vpow2.f32 %v1503_v34 }
 0xe67   :  { %v1612_v32 = vpop.eup %1611 }
 0xe68   :  { %1021 = vrot.lane.b32.xlu2 %v1612_v32, %s1658_s21  ;;  %v1614_v36 = vpop.eup %1613 }
 0xe69   :  { %v1067_v39 = vadd.f32 1.0, %v1614_v36 }
 0xe6b   :  { %1615 = vrcp.f32 %v1067_v39  ;;  %v1079_v45 = vand.u32 2147483648, %v1067_v39  ;;  %vm1073_vm5 = vweird.f32 %v1067_v39  ;;  %v1077_v15 = vand.u32 2147483647, %v1067_v39 }
 0xe6c   :  { %1617 = vpow2.f32 %v1501_v7 }
 0xe6d   :  { %v1080_v17 = vor.u32 1.1754944e-38, %v1079_v45  ;;  %vm1078_vm8 = vcmp.eq.f32.partialorder %v1077_v15, 8.507059e+37 }
 0xe71   :  { %v1616_v8 = vpop.eup %1615 }
 0xe72   :  { %v1069_v9 = vmul.f32 %v1616_v8, %v1067_v39  ;;  %v1618_v11 = vpop.eup %1617  ;;  %vm1074_vm4 = vweird.f32 %v1616_v8 }
 0xe73   :  { %v1002_v13 = vadd.f32 1.0, %v1618_v11  ;;  %vm1075_vm7 = vmor %vm1073_vm5, %vm1074_vm4 }
 0xe74   :  { %v1070_v10 = vsub.f32 1.0, %v1069_v9 }
 0xe75   :  { %1619 = vrcp.f32 %v1002_v13  ;;  %v1014_v26 = vand.u32 2147483648, %v1002_v13  ;;  %vm1008_vm10 = vweird.f32 %v1002_v13  ;;  %v1012_v27 = vand.u32 2147483647, %v1002_v13 }
 0xe76   :  { %v1071_v12 = vmul.f32 %v1616_v8, %v1070_v10 }
 0xe77   :  { %v1015_v31 = vor.u32 1.1754944e-38, %v1014_v26  ;;  %vm1013_vm12 = vcmp.eq.f32.partialorder %v1012_v27, 8.507059e+37 }
 0xe78   :  { %v1072_v14 = vadd.f32 %v1616_v8, %v1071_v12 }
 0xe7a   :  { %v1076_v16 = vsel %vm1075_vm7, %v1616_v8, %v1072_v14 }
 0xe7b   :  { %v1081_v19 = vsel %vm1078_vm8, %v1080_v17, %v1076_v16  ;;  %v1620_v21 = vpop.eup %1619 }
 0xe7c   :  { %v1004_v22 = vmul.f32 %v1620_v21, %v1002_v13  ;;  %vm1009_vm9 = vweird.f32 %v1620_v21  ;;  %v1084_v46 = vmul.f32 %v1081_v19, %v2002_v28 }
 0xe7d   :  { %vm1010_vm11 = vmor %vm1008_vm10, %vm1009_vm9  ;;  %vm1404_vm10 = vcmask 1041409  }
 0xe7e   :  { %v1005_v23 = vsub.f32 1.0, %v1004_v22 }
 0xe80   :  { %v1006_v24 = vmul.f32 %v1620_v21, %v1005_v23 }
 0xe82   :  { %v1007_v25 = vadd.f32 %v1620_v21, %v1006_v24 }
 0xe84   :  { %v1011_v29 = vsel %vm1010_vm11, %v1620_v21, %v1007_v25  ;;  %vm1408_vm11 = vcmask 1043459  }
 0xe85   :  { %v1016_v42 = vsel %vm1013_vm12, %v1015_v31, %v1011_v29  ;;  %vm1410_vm12 = vcmask 1044484  }
 0xe86   :  { %v1019_v51 = vmul.f32 %v1016_v42, %v2007_v54 }
 0xeaa   :  { %v1087_v18 = vpop.permute.xlu0 %1086 }
 0xeab   :  { %v1089_v20 = vmul.f32 %v1087_v18, %v1081_v19 }
 0xead   :  { %1091 = vrot.lane.b32.xlu2 %v1089_v20, %s1659_s22 }
 0xec2   :  { %v1022_v38 = vpop.permute.xlu2 %1021 }
 0xec3   :  { %v1024_v43 = vmul.f32 %v1022_v38, %v1016_v42 }
 0xec5   :  { %1026 = vrot.lane.b32.xlu1 %v1024_v43, %s1659_s22 }
 0xf07   :  { %v1092_v47 = vpop.permute.xlu2 %1091 }
 0xf08   :  { %v2053_v30 = vadd.f32 %v1092_v47, %v1084_v46 }
 0xf0a   :  { %1621 = vtanh.f32 %v2053_v30 }
 0xf10   :  { %v1622_v49 = vpop.eup %1621 }
 0xf11   :  { %1097 = vrot.lane.b32.xlu1 %v1622_v49, %s1658_s21 }
 0xf37   :  { %v1027_v52 = vpop.permute.xlu1 %1026 }
 0xf38   :  { %v2058_v41 = vadd.f32 %v1027_v52, %v1019_v51 }
 0xf3a   :  { %1623 = vtanh.f32 %v2058_v41 }
 0xf40   :  { %v1624_v55 = vpop.eup %1623 }
 0xf41   :  { %1032 = vrot.lane.b32.xlu0 %v1624_v55, %s1658_s21 }
 0xf83   :  { %v1098_v56 = vpop.permute.xlu1 %1097 }
 0xf84   :  { %v1100_v28 = vmul.f32 %v1098_v56, %v1081_v19 }
 0xf86   :  { %1124 = vrot.lane.b32.xlu0 %v1100_v28, %s1659_s22 }
 0xfb3   :  { %v1033_v57 = vpop.permute.xlu0 %1032 }
 0xfb4   :  { %v1035_v54 = vmul.f32 %v1033_v57, %v1016_v42 }
 0xfb6   :  { %1037 = vrot.lane.b32.xlu2 %v1035_v54, %s1659_s22 }
 0xff8   :  { %v1125_v44 = vpop.permute.xlu0 %1124 }
 0xff9   :  { %1505 = vmatmul.msk.f32.vlgmr.msra.gmra.mxu3 %vm139_vm6, %v1125_v44  ;;  %1507 = vmatmul.msk.f32.vlgmr.msrb.gmra.mxu1 %vm139_vm6, %v1125_v44 }
0x1010   :  { %v1038_v58 = vpop.permute.xlu2 %1037 }
0x1011   :  { %1041 = vst.msk [vmem:[#allocation3 + $0x28] sm:$0xff] %vm139_vm6, %v1038_v58  ;;  %1504 = vmatmul.msk.f32.vlgmr.msra.gmra.mxu2 %vm139_vm6, %v1038_v58 }
0x1076   :  { %v1210_v60 = vpop.f32.mrf.mxu1 }
0x1077   :  { %v1213_v61 = vadd.f32 %v1210_v60, %v128_v50 }
0x1079   :  { %1625 = vtanh.f32 %v1213_v61  ;;  %v1508_v2 = vmul.f32 -1.442695, %v1213_v61 }
0x107c   :  { %v1145_v53 = vpop.f32.mrf.mxu3 }
0x107f   :  { %v1626_v62 = vpop.eup %1625 }
0x1080   :  { %1236 = vrot.lane.b32.xlu2 %v1626_v62, %s1658_s21 }
0x1094   :  { %v1120_v37 = vpop.f32.mrf.mxu2 }
0x1095   :  { %v1146_v40 = vadd.f32 %v1145_v53, %v1120_v37 }
0x1097   :  { %v1148_v0 = vadd.f32 %v2077_v63, %v1146_v40 }
0x1099   :  { %1627 = vtanh.f32 %v1148_v0  ;;  %v1506_v11 = vmul.f32 -1.442695, %v1148_v0 }
0x109a   :  { %1629 = vpow2.f32 %v1508_v2  ;;  %v1519_v2 = vld [vmem:[%s2122_s7] ss:$0 sm:$0xff] }
0x109f   :  { %v1628_v1 = vpop.eup %1627 }
0x10a0   :  { %1171 = vrot.lane.b32.xlu1 %v1628_v1, %s1658_s21  ;;  %v1630_v4 = vpop.eup %1629 }
0x10a1   :  { %v1217_v33 = vadd.f32 1.0, %v1630_v4  ;;  %v1342_v4 = vld [vmem:[#allocation3] sm:$0xff] }
0x10a3   :  { %1631 = vrcp.f32 %v1217_v33  ;;  %v1229_v34 = vand.u32 2147483648, %v1217_v33  ;;  %vm1223_vm13 = vweird.f32 %v1217_v33  ;;  %v1227_v36 = vand.u32 2147483647, %v1217_v33 }
0x10a4   :  { %1633 = vpow2.f32 %v1506_v11 }
0x10a5   :  { %v1230_v8 = vor.u32 1.1754944e-38, %v1229_v34  ;;  %vm1228_vm15 = vcmp.eq.f32.partialorder %v1227_v36, 8.507059e+37 }
0x10a9   :  { %v1632_v5 = vpop.eup %1631 }
0x10aa   :  { %v1219_v35 = vmul.f32 %v1632_v5, %v1217_v33  ;;  %vm1224_vm1 = vweird.f32 %v1632_v5  ;;  %v1634_v12 = vpop.eup %1633  ;;  %v1354_v33 = vmul.f32 %v1519_v2, %v1342_v4 }
0x10ab   :  { %vm1225_vm14 = vmor %vm1223_vm13, %vm1224_vm1  ;;  %v1152_v13 = vadd.f32 1.0, %v1634_v12  ;;  %vm1412_vm1 = vcmask 1045509   ;;  %vm1414_vm13 = vcmask 1046534  }
0x10ac   :  { %v1220_v3 = vsub.f32 1.0, %v1219_v35  ;;  %v1346_v35 = vld [vmem:[#allocation3 + $0x20] sm:$0xff] }
0x10ad   :  { %1635 = vrcp.f32 %v1152_v13  ;;  %v1164_v18 = vand.u32 2147483648, %v1152_v13  ;;  %vm1158_vm2 = vweird.f32 %v1152_v13  ;;  %v1162_v19 = vand.u32 2147483647, %v1152_v13 }
0x10ae   :  { %v1221_v6 = vmul.f32 %v1632_v5, %v1220_v3  ;;  %v1358_v3 = vmul.f32 %v1519_v2, %v1346_v35 }
0x10af   :  { %v1165_v21 = vor.u32 1.1754944e-38, %v1164_v18  ;;  %vm1163_vm4 = vcmp.eq.f32.partialorder %v1162_v19, 8.507059e+37 }
0x10b0   :  { %v1222_v32 = vadd.f32 %v1632_v5, %v1221_v6  ;;  %v1374_v6 = vsel %vm139_vm6, %v1358_v3, 0.0 }
0x10b2   :  { %v1226_v39 = vsel %vm1225_vm14, %v1632_v5, %v1222_v32  ;;  %v1362_v5 = vsel %vm139_vm6, %v1354_v33, 0.0  ;;  %vm1416_vm14 = vcmask 1047559  }
0x10b3   :  { %v1231_v9 = vsel %vm1228_vm15, %v1230_v8, %v1226_v39  ;;  %v1636_v14 = vpop.eup %1635  ;;  %v1343_v8 = vld [vmem:[#allocation3 + $0x8] sm:$0xff]  ;;  %vm1459_vm15 = vcmask 64512  }
0x10b4   :  { %v1154_v45 = vmul.f32 %v1636_v14, %v1152_v13  ;;  %vm1159_vm0 = vweird.f32 %v1636_v14  ;;  %v1234_v25 = vmul.f32 %v1231_v9, %v2053_v30  ;;  %v1347_v13 = vld [vmem:[#allocation3 + $0x28] sm:$0xff] }
0x10b5   :  { %vm1160_vm3 = vmor %vm1158_vm2, %vm1159_vm0 }
0x10b6   :  { %v1155_v15 = vsub.f32 1.0, %v1154_v45 }
0x10b8   :  { %v1156_v16 = vmul.f32 %v1636_v14, %v1155_v15 }
0x10ba   :  { %v1157_v17 = vadd.f32 %v1636_v14, %v1156_v16 }
0x10bc   :  { %v1161_v20 = vsel %vm1160_vm3, %v1636_v14, %v1157_v17  ;;  %v1359_v14 = vmul.f32 %v1519_v2, %v1347_v13  ;;  %v1344_v17 = vld [vmem:[#allocation3 + $0x10] sm:$0xff] }
0x10bd   :  { %v1166_v23 = vsel %vm1163_vm4, %v1165_v21, %v1161_v20  ;;  %v1356_v18 = vmul.f32 %v1519_v2, %v1344_v17 }
0x10be   :  { %v1169_v31 = vmul.f32 %v1166_v23, %v2058_v41  ;;  %v1377_v45 = vsel %vm139_vm6, %v1359_v14, 0.0 }
0x10bf   :  { %v1368_v19 = vsel %vm139_vm6, %v1356_v18, 0.0 }
0x10da   :  { %v1237_v7 = vpop.permute.xlu2 %1236 }
0x10db   :  { %v1239_v10 = vmul.f32 %v1237_v7, %v1231_v9  ;;  %v1355_v7 = vmul.f32 %v1519_v2, %v1343_v8 }
0x10dd   :  { %1241 = vrot.lane.b32.xlu1 %v1239_v10, %s1659_s22  ;;  %v1345_v10 = vld [vmem:[#allocation3 + $0x18] sm:$0xff] }
0x10de   :  { %v1357_v11 = vmul.f32 %v1519_v2, %v1345_v10 }
0x10e0   :  { %v1371_v12 = vsel %vm139_vm6, %v1357_v11, 0.0 }
0x1112   :  { %v1172_v22 = vpop.permute.xlu1 %1171 }
0x1113   :  { %v1174_v24 = vmul.f32 %v1172_v22, %v1166_v23 }
0x1115   :  { %1176 = vrot.lane.b32.xlu0 %v1174_v24, %s1659_s22 }
0x114f   :  { %v1242_v26 = vpop.permute.xlu1 %1241 }
0x1150   :  { %v1244_v27 = vadd.f32 %v1242_v26, %v1234_v25 }
0x1152   :  { %1637 = vtanh.f32 %v1244_v27  ;;  %v14_v27 = vstv %s2123_s8 }
0x1153   :  { %15 = vst [vmem:[#allocation4] sm:$0x1] %v14_v27 }
0x1158   :  { %v1638_v29 = vpop.eup %1637 }
0x1159   :  { %1247 = vrot.lane.b32.xlu0 %v1638_v29, %s1658_s21  ;;  %v1660_v29 = vmov 0  }
0x115a   :  { %1516 = vset.pattern.permute.xlu0 %v1660_v29 }
0x1187   :  { %v1177_v38 = vpop.permute.xlu0 %1176 }
0x1188   :  { %v1179_v42 = vadd.f32 %v1177_v38, %v1169_v31  ;;  %v1520_v38 = vld [vmem:[#allocation4] ss:$0 sm:$0xff] }
0x118a   :  { %1639 = vtanh.f32 %v1179_v42 }
0x1190   :  { %v1640_v43 = vpop.eup %1639 }
0x1191   :  { %1182 = vrot.lane.b32.xlu2 %v1640_v43, %s1658_s21 }
0x11cb   :  { %v1248_v46 = vpop.permute.xlu0 %1247 }
0x11cc   :  { %v1250_v47 = vmul.f32 %v1248_v46, %v1231_v9  ;;  %v1365_v9 = vsel %vm139_vm6, %v1355_v7, 0.0 }
0x11ce   :  { %1274 = vrot.lane.b32.xlu2 %v1250_v47, %s1659_s22 }
0x11eb   :  { %v1183_v49 = vpop.permute.xlu2 %1182 }
0x11ec   :  { %v1185_v30 = vmul.f32 %v1183_v49, %v1166_v23 }
0x11ee   :  { %1187 = vrot.lane.b32.xlu1 %v1185_v30, %s1659_s22 }
0x1228   :  { %v1275_v51 = vpop.permute.xlu2 %1274 }
0x1229   :  { %1510 = vmatmul.msk.f32.vlgmr.msrb.gmra.mxu3 %vm139_vm6, %v1275_v51 }
0x1260   :  { %v1188_v52 = vpop.permute.xlu1 %1187 }
0x1261   :  { %1191 = vst.msk [vmem:[#allocation3 + $0x30] sm:$0xff] %vm139_vm6, %v1188_v52  ;;  %1509 = vmatmul.msk.f32.vlgmr.msrb.gmra.mxu2 %vm139_vm6, %v1188_v52 }
0x1268   :  { %v1348_v20 = vld [vmem:[#allocation3 + $0x30] sm:$0xff] }
0x1269   :  { %v1360_v21 = vmul.f32 %v1519_v2, %v1348_v20 }
0x126b   :  { %v1380_v22 = vsel %vm139_vm6, %v1360_v21, 0.0 }
0x12ac   :  { %v1295_v41 = vpop.f32.mrf.mxu3 }
0x12e4   :  { %v1270_v55 = vpop.f32.mrf.mxu2 }
0x12e5   :  { %v1296_v56 = vadd.f32 %v1295_v41, %v1270_v55 }
0x12e7   :  { %v1298_v28 = vadd.f32 %v2077_v63, %v1296_v56 }
0x12e9   :  { %1641 = vtanh.f32 %v1298_v28  ;;  %v1511_v57 = vmul.f32 -1.442695, %v1298_v28 }
0x12eb   :  { %1643 = vpow2.f32 %v1511_v57 }
0x12ef   :  { %v1642_v48 = vpop.eup %1641 }
0x12f0   :  { %1321 = vrot.lane.b32.xlu0 %v1642_v48, %s1658_s21 }
0x12f1   :  { %v1644_v54 = vpop.eup %1643 }
0x12f2   :  { %v1302_v44 = vadd.f32 1.0, %v1644_v54 }
0x12f4   :  { %1645 = vrcp.f32 %v1302_v44  ;;  %v1314_v62 = vand.u32 2147483648, %v1302_v44  ;;  %vm1308_vm7 = vweird.f32 %v1302_v44  ;;  %v1312_v53 = vand.u32 2147483647, %v1302_v44 }
0x12f6   :  { %v1315_v40 = vor.u32 1.1754944e-38, %v1314_v62  ;;  %vm1313_vm9 = vcmp.eq.f32.partialorder %v1312_v53, 8.507059e+37 }
0x12fa   :  { %v1646_v58 = vpop.eup %1645 }
0x12fb   :  { %v1304_v59 = vmul.f32 %v1646_v58, %v1302_v44  ;;  %vm1309_vm5 = vweird.f32 %v1646_v58 }
0x12fc   :  { %vm1310_vm8 = vmor %vm1308_vm7, %vm1309_vm5 }
0x12fd   :  { %v1305_v50 = vsub.f32 1.0, %v1304_v59 }
0x12ff   :  { %v1306_v60 = vmul.f32 %v1646_v58, %v1305_v50 }
0x1301   :  { %v1307_v61 = vadd.f32 %v1646_v58, %v1306_v60 }
0x1303   :  { %v1311_v37 = vsel %vm1310_vm8, %v1646_v58, %v1307_v61 }
0x1304   :  { %v1316_v0 = vsel %vm1313_vm9, %v1315_v40, %v1311_v37 }
0x1305   :  { %v1319_v32 = vmul.f32 %v1316_v0, %v1179_v42  ;;  %v1394_v42 = vlaneseq }
0x1307   :  { %v1395_v46 = vand.u32 127, %v1394_v42 }
0x1362   :  { %v1322_v63 = vpop.permute.xlu0 %1321 }
0x1363   :  { %v1324_v1 = vmul.f32 %v1322_v63, %v1316_v0 }
0x1365   :  { %1326 = vrot.lane.b32.xlu1 %v1324_v1, %s1659_s22 }
0x138f   :  { %1363 = vadd.xlane.f32.xlu1 %v1362_v5 }
0x1397   :  { %1375 = vadd.xlane.f32.xlu1 %v1374_v6 }
0x13d7   :  { %v1327_v34 = vpop.permute.xlu1 %1326 }
0x13d8   :  { %v1329_v36 = vadd.f32 %v1327_v34, %v1319_v32 }
0x13da   :  { %1647 = vtanh.f32 %v1329_v36 }
0x13e0   :  { %v1648_v39 = vpop.eup %1647 }
0x13e1   :  { %1332 = vrot.lane.b32.xlu2 %v1648_v39, %s1658_s21 }
0x1402   :  { %v1364_v43 = vpop.xlane.xlu1 %1363 }
0x1403   :  { %v1396_v52 = vperm.slane %v1364_v43, %v1395_v46 }
0x140a   :  { %1366 = vadd.xlane.f32.xlu2 %v1365_v9  ;;  %v1376_v55 = vpop.xlane.xlu1 %1375 }
0x140b   :  { %v1400_v54 = vperm.slane %v1376_v55, %v1395_v46 }
0x1412   :  { %1372 = vadd.xlane.f32.xlu2 %v1371_v12 }
0x141a   :  { %1378 = vadd.xlane.f32.xlu2 %v1377_v45 }
0x143b   :  { %v1333_v15 = vpop.permute.xlu2 %1332 }
0x143c   :  { %v1335_v16 = vmul.f32 %v1333_v15, %v1316_v0 }
0x143e   :  { %1337 = vrot.lane.b32.xlu0 %v1335_v16, %s1659_s22 }
0x1468   :  { %1369 = vadd.xlane.f32.xlu0 %v1368_v19 }
0x1470   :  { %1381 = vadd.xlane.f32.xlu0 %v1380_v22 }
0x147d   :  { %v1367_v31 = vpop.xlane.xlu2 %1366 }
0x147e   :  { %v1397_v30 = vperm.slane %v1367_v31, %v1395_v46 }
0x1480   :  { %v1405_v41 = vsel %vm1404_vm10, %v1397_v30, %v1396_v52 }
0x1484   :  { %1455 = vperm.xlu0 %1516, %v1520_v38  }
0x1485   :  { %v1373_v49 = vpop.xlane.xlu2 %1372 }
0x1486   :  { %v1399_v28 = vperm.slane %v1373_v49, %v1395_v46 }
0x148d   :  { %v1379_v44 = vpop.xlane.xlu2 %1378 }
0x148e   :  { %v1401_v50 = vperm.slane %v1379_v44, %v1395_v46 }
0x14b0   :  { %v1338_v23 = vpop.permute.xlu0 %1337 }
0x14b1   :  { %1341 = vst.msk [vmem:[#allocation3 + $0x38] sm:$0xff] %vm139_vm6, %v1338_v23 }
0x14b8   :  { %v1349_v24 = vld [vmem:[#allocation3 + $0x38] sm:$0xff] }
0x14b9   :  { %v1361_v25 = vmul.f32 %v1519_v2, %v1349_v24 }
0x14bb   :  { %v1383_v26 = vsel %vm139_vm6, %v1361_v25, 0.0  ;;  %vm1406_vm6 = vcmask 1042434  }
0x14bc   :  { %1384 = vadd.xlane.f32.xlu1 %v1383_v26 }
0x14db   :  { %v1370_v47 = vpop.xlane.xlu0 %1369 }
0x14dc   :  { %v1398_v51 = vperm.slane %v1370_v47, %v1395_v46 }
0x14de   :  { %v1407_v56 = vsel %vm1406_vm6, %v1398_v51, %v1405_v41 }
0x14df   :  { %v1409_v48 = vsel %vm1408_vm11, %v1399_v28, %v1407_v56 }
0x14e0   :  { %v1411_v59 = vsel %vm1410_vm12, %v1400_v54, %v1409_v48 }
0x14e1   :  { %v1413_v62 = vsel %vm1412_vm1, %v1401_v50, %v1411_v59 }
0x14e3   :  { %v1382_v57 = vpop.xlane.xlu0 %1381 }
0x14e4   :  { %v1402_v58 = vperm.slane %v1382_v57, %v1395_v46 }
0x14e6   :  { %v1415_v53 = vsel %vm1414_vm13, %v1402_v58, %v1413_v62 }
0x14f6   :  { %v1456_v40 = vpop.permute.xlu0 %1455 }
0x152f   :  { %v1385_v60 = vpop.xlane.xlu1 %1384 }
0x1530   :  { %v1403_v61 = vperm.slane %v1385_v60, %v1395_v46 }
0x1532   :  { %v1417_v37 = vsel %vm1416_vm14, %v1403_v61, %v1415_v53 }
0x1533   :  { %1419 = vxpose.xlu2.b32.start.end [1/1] (short) (narrow) %v1417_v37, 8 }
0x15cc   :  { %v1435_v63 = vpop.trf.xlu2 }
0x15cd   :  { %v1458_v0 = vadd.f32 %v1456_v40, %v1435_v63 }
0x15cf   :  { %1460 = vst.msk [vmem:[%s2124_s9] sm:$0xff] %vm1459_vm15, %v1458_v0 }

</bundles_post_ra>
